<compile_context>
chip_gen: v5e
topology: v5e:2x2
jax: 0.10.0
libtpu: 0.0.40
codegen_flags: <defaults>
</compile_context>

<pallas_src>
import functools

import jax
import jax.numpy as jnp
import numpy as np
from jax import lax
from jax.experimental import pallas as pl
from jax.experimental.pallas import tpu as pltpu


def _make_tap_masks_np(H, W):
    """(9, H*W) f32 validity mask per 3x3 tap for 'same' padding (host constant,
    folded at trace time — no in-kernel div/mod)."""
    idx = np.arange(H * W)
    h, w = idx // W, idx % W
    rows = []
    for dy in (-1, 0, 1):
        for dx in (-1, 0, 1):
            valid = (h + dy >= 0) & (h + dy < H) & (w + dx >= 0) & (w + dx < W)
            rows.append(valid.astype(np.float32))
    return np.stack(rows, axis=0)


def _conv3x3_relu(x, w_r, b, m_ref, patches_ref, *, W, lanes, matmul_dtype):
    """x: (Cin, lanes) f32, w_r: (Cout, 9*Cin) tap-major, b: (Cout, 1) f32.
    m_ref: (9, lanes) tap-validity masks (tiled per image).
    patches_ref: persistent VMEM scratch reused across layers.
    Returns ReLU(conv3x3_same(x) + b) as (Cout, lanes) f32."""
    cin = x.shape[0]
    t = 0
    for dy in (-1, 0, 1):
        for dx in (-1, 0, 1):
            s = dy * W + dx                                  # flat tap offset
            # Roll over the FULL lane block; wrap-around reads (image borders
            # and cross-image reads) are zeroed by the masks.
            shifted = x if s == 0 else pltpu.roll(x, (-s) % lanes, axis=1)
            patches_ref[t * cin:(t + 1) * cin, :] = shifted * m_ref[t:t + 1, :]
            t += 1
    patches = patches_ref[0:9 * cin, :]                      # (9*Cin, lanes)
    lhs = w_r.astype(matmul_dtype)
    rhs = patches.astype(matmul_dtype)
    acc = jnp.dot(lhs, rhs, preferred_element_type=jnp.float32)
    return jnp.maximum(acc + b, 0.0)                         # b broadcasts over lanes


def _edge_net_kernel(m_ref, x_ref, w1_ref, b1_ref, w2_ref, b2_ref, w3_ref, b3_ref,
                     o1_ref, o2_ref, o3_ref, patches_ref, *, W, lanes, matmul_dtype):
    conv = functools.partial(_conv3x3_relu, m_ref=m_ref, patches_ref=patches_ref,
                             W=W, lanes=lanes, matmul_dtype=matmul_dtype)
    x0 = x_ref[...].astype(jnp.float32)                      # (8,  lanes)
    y1 = conv(x0, w1_ref[...], b1_ref[...])                  # (16, lanes)
    o1_ref[...] = y1.astype(o1_ref.dtype)
    y2 = conv(y1, w2_ref[...], b2_ref[...])                  # (32, lanes)
    o2_ref[...] = y2.astype(o2_ref.dtype)
    y3 = conv(y2, w3_ref[...], b3_ref[...])                  # (1,  lanes)  M=1, ~3% FLOPs
    o3_ref[...] = y3.astype(o3_ref.dtype)


def _pick_images_per_step(N, HW, *, min_grid=2, max_lane_block=4096):
    """Largest divisor of N that keeps >= min_grid grid steps (v7x megacore)
    and a modest lane block (bounds the im2col scratch VMEM)."""
    best = 1
    for nb in range(1, N + 1):
        if N % nb:
            continue
        if (N // nb) < min(min_grid, N):
            continue
        if nb * HW > max_lane_block:
            continue
        best = nb
    return best


def edge_net_forward(x_nchw, params, *, images_per_step=None,
                     matmul_dtype=jnp.float32):
    """Matches Edge_Net.forward: returns (x1, x2, x3), each NCHW."""
    w1, b1, w2, b2, w3, b3 = params                # OIHW weights, (Cout,) biases
    N, Cin, H, W = x_nchw.shape
    HW = H * W
    C1, C2, C3 = w1.shape[0], w2.shape[0], w3.shape[0]
    CIN_PAD = 8                                    # layer-1 Cin padded to a sublane group

    Nb = images_per_step if images_per_step is not None else _pick_images_per_step(N, HW)
    assert N % Nb == 0, "images_per_step must divide the batch"
    lanes = Nb * HW
    assert lanes % 128 == 0, "images_per_step * H * W must be a multiple of 128"

    # Channel-major, lane-dense layout (C, N*H*W); zero-pad layer-1 Cin 3 -> 8.
    x_cl = jnp.transpose(x_nchw.reshape(N, Cin, HW), (1, 0, 2)).reshape(Cin, N * HW)
    x_cl = jnp.pad(x_cl, ((0, CIN_PAD - Cin), (0, 0)))

    def w_flat(w, cin_pad=None):                   # OIHW -> (Cout, 9*Cin), tap-major
        cout, cin = w.shape[0], w.shape[1]
        wt = jnp.transpose(w, (0, 2, 3, 1))        # (O, ky, kx, I)
        if cin_pad is not None and cin_pad > cin:
            wt = jnp.pad(wt, ((0, 0), (0, 0), (0, 0), (0, cin_pad - cin)))
            cin = cin_pad
        return wt.reshape(cout, 9 * cin).astype(jnp.float32)

    w1r = w_flat(w1, CIN_PAD)
    w2r, w3r = w_flat(w2), w_flat(w3)
    b1c = b1.reshape(-1, 1).astype(jnp.float32)
    b2c = b2.reshape(-1, 1).astype(jnp.float32)
    b3c = b3.reshape(-1, 1).astype(jnp.float32)

    # Precomputed boundary masks, tiled once per image across the lane block.
    masks = jnp.asarray(np.tile(_make_tap_masks_np(H, W), (1, Nb)))   # (9, lanes)

    kernel = functools.partial(_edge_net_kernel, W=W, lanes=lanes,
                               matmul_dtype=matmul_dtype)
    const = lambda n: (0, 0)
    lane_block = lambda n: (0, n)

    y1, y2, y3 = pl.pallas_call(
        kernel,
        out_shape=(
            jax.ShapeDtypeStruct((C1, N * HW), x_nchw.dtype),
            jax.ShapeDtypeStruct((C2, N * HW), x_nchw.dtype),
            jax.ShapeDtypeStruct((C3, N * HW), x_nchw.dtype),
        ),
        grid=(N // Nb,),
        in_specs=[
            pl.BlockSpec((9, lanes), const),                 # tap-validity masks
            pl.BlockSpec((CIN_PAD, lanes), lane_block),      # input pixels
            pl.BlockSpec((C1, 9 * CIN_PAD), const),
            pl.BlockSpec((C1, 1), const),
            pl.BlockSpec((C2, 9 * C1), const),
            pl.BlockSpec((C2, 1), const),
            pl.BlockSpec((C3, 9 * C2), const),
            pl.BlockSpec((C3, 1), const),
        ],
        out_specs=(
            pl.BlockSpec((C1, lanes), lane_block),
            pl.BlockSpec((C2, lanes), lane_block),
            pl.BlockSpec((C3, lanes), lane_block),
        ),
        scratch_shapes=[pltpu.VMEM((9 * max(CIN_PAD, C1, C2), lanes), jnp.float32)],
        compiler_params=pltpu.CompilerParams(
            dimension_semantics=("parallel",)),
    )(masks, x_cl, w1r, b1c, w2r, b2c, w3r, b3c)

    def to_nchw(y, c):
        return jnp.transpose(y.reshape(c, N, H, W), (1, 0, 2, 3))

    return to_nchw(y1, C1), to_nchw(y2, C2), to_nchw(y3, C3)


def init_edge_net_params(key, dtype=jnp.float32):
    """Deterministic synthetic params, PyTorch OIHW shapes:
    conv1 (16,3,3,3), conv2 (32,16,3,3), conv3 (1,32,3,3)."""
    keys = jax.random.split(key, 6)

    def conv_params(kw, kb, cin, cout):
        fan_in = cin * 9
        bound = 1.0 / (fan_in ** 0.5)
        w = jax.random.uniform(kw, (cout, cin, 3, 3), dtype, -bound, bound)
        b = jax.random.uniform(kb, (cout,), dtype, -bound, bound)
        return w, b

    w1, b1 = conv_params(keys[0], keys[1], 3, 16)
    w2, b2 = conv_params(keys[2], keys[3], 16, 32)
    w3, b3 = conv_params(keys[4], keys[5], 32, 1)
    return (w1, b1, w2, b2, w3, b3)


def _reference_forward(x_nchw, params):
    """Pure-JAX reference (lax.conv, NCHW/OIHW like PyTorch) for correctness."""
    w1, b1, w2, b2, w3, b3 = params
    dn = ("NCHW", "OIHW", "NCHW")

    def conv(x, w, b):
        y = lax.conv_general_dilated(x, w, (1, 1), "SAME", dimension_numbers=dn)
        return jnp.maximum(y + b.reshape(1, -1, 1, 1), 0.0)

    x1 = conv(x_nchw, w1, b1)
    x2 = conv(x1, w2, b2)
    x3 = conv(x2, w3, b3)
    return x1, x2, x3


if __name__ == "__main__":
    key = jax.random.PRNGKey(0)
    kx, kp = jax.random.split(key)
    params = init_edge_net_params(kp)

    # Case 1: PyTorch-like small batch (N=2, 3x16x16), f32 MXU path, grid=(2,).
    x = jax.random.normal(kx, (2, 3, 16, 16), jnp.float32)
    fwd = jax.jit(edge_net_forward)
    outs = jax.block_until_ready(fwd(x, params))
    refs = _reference_forward(x, params)
    for o, r in zip(outs, refs):
        assert o.shape == r.shape and o.dtype == r.dtype
        assert jnp.allclose(o, r, atol=1e-4, rtol=1e-4)
    assert outs[0].shape == (2, 16, 16, 16)
    assert outs[1].shape == (2, 32, 16, 16)
    assert outs[2].shape == (2, 1, 16, 16)

    # Case 2: lane-axis image batching (2 images per grid step) — exercises the
    # full-lane-length roll modulo and the per-image mask tiling.
    x4 = jax.random.normal(kx, (4, 3, 16, 16), jnp.float32)
    fwd_batched = jax.jit(functools.partial(edge_net_forward, images_per_step=2))
    outs4 = jax.block_until_ready(fwd_batched(x4, params))
    refs4 = _reference_forward(x4, params)
    for o, r in zip(outs4, refs4):
        assert o.shape == r.shape
        assert jnp.allclose(o, r, atol=1e-4, rtol=1e-4)

    # Case 3: bf16 MXU inputs (v6e/v7x fast path); f32 accumulation retained.
    fwd_bf16 = jax.jit(functools.partial(edge_net_forward,
                                         matmul_dtype=jnp.bfloat16))
    outs_bf16 = jax.block_until_ready(fwd_bf16(x, params))
    for o, r in zip(outs_bf16, refs):
        assert o.shape == r.shape
        assert jnp.allclose(o, r, atol=1e-1, rtol=1e-1)

    print("KERNEL_OK")
</pallas_src>

<mosaic_0001>
module attributes {stable_mosaic.version = 11 : i64} {
  func.func @_edge_net_kernel(%arg0: i32, %arg1: memref<9x256xf32, #tpu.memory_space<vmem>>, %arg2: memref<8x256xf32, #tpu.memory_space<vmem>>, %arg3: memref<16x72xf32, #tpu.memory_space<vmem>>, %arg4: memref<16x1xf32, #tpu.memory_space<vmem>>, %arg5: memref<32x144xf32, #tpu.memory_space<vmem>>, %arg6: memref<32x1xf32, #tpu.memory_space<vmem>>, %arg7: memref<1x288xf32, #tpu.memory_space<vmem>>, %arg8: memref<1x1xf32, #tpu.memory_space<vmem>>, %arg9: memref<16x256xf32, #tpu.memory_space<vmem>>, %arg10: memref<32x256xf32, #tpu.memory_space<vmem>>, %arg11: memref<1x256xf32, #tpu.memory_space<vmem>>, %arg12: memref<288x256xf32, #tpu.memory_space<vmem>>) attributes {dimension_semantics = [#tpu.dimension_semantics<parallel>], iteration_bounds = array<i64: 2>, scalar_prefetch = 0 : i64, scratch_operands = 1 : i64, tpu.core_type = #tpu.core_type<tc>, window_params = [{pipeline_mode = #tpu.pipeline_mode<synchronous>, transform_indices = @transform_0, window_bounds = array<i64: 9, 256>}, {transform_indices = @transform_1, window_bounds = array<i64: 8, 256>}, {pipeline_mode = #tpu.pipeline_mode<synchronous>, transform_indices = @transform_2, window_bounds = array<i64: 16, 72>}, {pipeline_mode = #tpu.pipeline_mode<synchronous>, transform_indices = @transform_3, window_bounds = array<i64: 16, 1>}, {pipeline_mode = #tpu.pipeline_mode<synchronous>, transform_indices = @transform_4, window_bounds = array<i64: 32, 144>}, {pipeline_mode = #tpu.pipeline_mode<synchronous>, transform_indices = @transform_5, window_bounds = array<i64: 32, 1>}, {pipeline_mode = #tpu.pipeline_mode<synchronous>, transform_indices = @transform_6, window_bounds = array<i64: 1, 288>}, {pipeline_mode = #tpu.pipeline_mode<synchronous>, transform_indices = @transform_7, window_bounds = array<i64: 1, 1>}, {transform_indices = @transform_8, window_bounds = array<i64: 16, 256>}, {transform_indices = @transform_9, window_bounds = array<i64: 32, 256>}, {transform_indices = @transform_10, window_bounds = array<i64: 1, 256>}]} {
    %c0 = arith.constant 0 : index
    %c0_0 = arith.constant 0 : index
    %0 = vector.load %arg2[%c0, %c0_0] : memref<8x256xf32, #tpu.memory_space<vmem>>, vector<8x256xf32>
    %c0_1 = arith.constant 0 : index
    %c0_2 = arith.constant 0 : index
    %1 = vector.load %arg3[%c0_1, %c0_2] : memref<16x72xf32, #tpu.memory_space<vmem>>, vector<16x72xf32>
    %c0_3 = arith.constant 0 : index
    %c0_4 = arith.constant 0 : index
    %2 = vector.load %arg4[%c0_3, %c0_4] : memref<16x1xf32, #tpu.memory_space<vmem>>, vector<16x1xf32>
    %c17_i32 = arith.constant 17 : i32
    %3 = tpu.dynamic_rotate %0 by %c17_i32 dim 1 : vector<8x256xf32>, i32 -> vector<8x256xf32>
    %c0_5 = arith.constant 0 : index
    %c0_6 = arith.constant 0 : index
    %4 = vector.load %arg1[%c0_5, %c0_6] : memref<9x256xf32, #tpu.memory_space<vmem>>, vector<1x256xf32>
    %5 = vector.broadcast %4 : vector<1x256xf32> to vector<8x256xf32>
    %6 = arith.mulf %3, %5 : vector<8x256xf32>
    %c0_7 = arith.constant 0 : index
    %c0_8 = arith.constant 0 : index
    %7 = vector.load %arg12[%c0_7, %c0_8] : memref<288x256xf32, #tpu.memory_space<vmem>>, vector<8x256xf32>
    tpu.vector_store %arg12[%c0_7, %c0_8], %6 {strides = array<i32>} : memref<288x256xf32, #tpu.memory_space<vmem>>, vector<8x256xf32>,
    %c16_i32 = arith.constant 16 : i32
    %8 = tpu.dynamic_rotate %0 by %c16_i32 dim 1 : vector<8x256xf32>, i32 -> vector<8x256xf32>
    %c1 = arith.constant 1 : index
    %c0_9 = arith.constant 0 : index
    %9 = vector.load %arg1[%c1, %c0_9] : memref<9x256xf32, #tpu.memory_space<vmem>>, vector<1x256xf32>
    %10 = vector.broadcast %9 : vector<1x256xf32> to vector<8x256xf32>
    %11 = arith.mulf %8, %10 : vector<8x256xf32>
    %c8 = arith.constant 8 : index
    %c0_10 = arith.constant 0 : index
    %12 = vector.load %arg12[%c8, %c0_10] : memref<288x256xf32, #tpu.memory_space<vmem>>, vector<8x256xf32>
    tpu.vector_store %arg12[%c8, %c0_10], %11 {strides = array<i32>} : memref<288x256xf32, #tpu.memory_space<vmem>>, vector<8x256xf32>,
    %c15_i32 = arith.constant 15 : i32
    %13 = tpu.dynamic_rotate %0 by %c15_i32 dim 1 : vector<8x256xf32>, i32 -> vector<8x256xf32>
    %c2 = arith.constant 2 : index
    %c0_11 = arith.constant 0 : index
    %14 = vector.load %arg1[%c2, %c0_11] : memref<9x256xf32, #tpu.memory_space<vmem>>, vector<1x256xf32>
    %15 = vector.broadcast %14 : vector<1x256xf32> to vector<8x256xf32>
    %16 = arith.mulf %13, %15 : vector<8x256xf32>
    %c16 = arith.constant 16 : index
    %c0_12 = arith.constant 0 : index
    %17 = vector.load %arg12[%c16, %c0_12] : memref<288x256xf32, #tpu.memory_space<vmem>>, vector<8x256xf32>
    tpu.vector_store %arg12[%c16, %c0_12], %16 {strides = array<i32>} : memref<288x256xf32, #tpu.memory_space<vmem>>, vector<8x256xf32>,
    %c1_i32 = arith.constant 1 : i32
    %18 = tpu.dynamic_rotate %0 by %c1_i32 dim 1 : vector<8x256xf32>, i32 -> vector<8x256xf32>
    %c3 = arith.constant 3 : index
    %c0_13 = arith.constant 0 : index
    %19 = vector.load %arg1[%c3, %c0_13] : memref<9x256xf32, #tpu.memory_space<vmem>>, vector<1x256xf32>
    %20 = vector.broadcast %19 : vector<1x256xf32> to vector<8x256xf32>
    %21 = arith.mulf %18, %20 : vector<8x256xf32>
    %c24 = arith.constant 24 : index
    %c0_14 = arith.constant 0 : index
    %22 = vector.load %arg12[%c24, %c0_14] : memref<288x256xf32, #tpu.memory_space<vmem>>, vector<8x256xf32>
    tpu.vector_store %arg12[%c24, %c0_14], %21 {strides = array<i32>} : memref<288x256xf32, #tpu.memory_space<vmem>>, vector<8x256xf32>,
    %c4 = arith.constant 4 : index
    %c0_15 = arith.constant 0 : index
    %23 = vector.load %arg1[%c4, %c0_15] : memref<9x256xf32, #tpu.memory_space<vmem>>, vector<1x256xf32>
    %24 = vector.broadcast %23 : vector<1x256xf32> to vector<8x256xf32>
    %25 = arith.mulf %0, %24 : vector<8x256xf32>
    %c32 = arith.constant 32 : index
    %c0_16 = arith.constant 0 : index
    %26 = vector.load %arg12[%c32, %c0_16] : memref<288x256xf32, #tpu.memory_space<vmem>>, vector<8x256xf32>
    tpu.vector_store %arg12[%c32, %c0_16], %25 {strides = array<i32>} : memref<288x256xf32, #tpu.memory_space<vmem>>, vector<8x256xf32>,
    %c255_i32 = arith.constant 255 : i32
    %27 = tpu.dynamic_rotate %0 by %c255_i32 dim 1 : vector<8x256xf32>, i32 -> vector<8x256xf32>
    %c5 = arith.constant 5 : index
    %c0_17 = arith.constant 0 : index
    %28 = vector.load %arg1[%c5, %c0_17] : memref<9x256xf32, #tpu.memory_space<vmem>>, vector<1x256xf32>
    %29 = vector.broadcast %28 : vector<1x256xf32> to vector<8x256xf32>
    %30 = arith.mulf %27, %29 : vector<8x256xf32>
    %c40 = arith.constant 40 : index
    %c0_18 = arith.constant 0 : index
    %31 = vector.load %arg12[%c40, %c0_18] : memref<288x256xf32, #tpu.memory_space<vmem>>, vector<8x256xf32>
    tpu.vector_store %arg12[%c40, %c0_18], %30 {strides = array<i32>} : memref<288x256xf32, #tpu.memory_space<vmem>>, vector<8x256xf32>,
    %c241_i32 = arith.constant 241 : i32
    %32 = tpu.dynamic_rotate %0 by %c241_i32 dim 1 : vector<8x256xf32>, i32 -> vector<8x256xf32>
    %c6 = arith.constant 6 : index
    %c0_19 = arith.constant 0 : index
    %33 = vector.load %arg1[%c6, %c0_19] : memref<9x256xf32, #tpu.memory_space<vmem>>, vector<1x256xf32>
    %34 = vector.broadcast %33 : vector<1x256xf32> to vector<8x256xf32>
    %35 = arith.mulf %32, %34 : vector<8x256xf32>
    %c48 = arith.constant 48 : index
    %c0_20 = arith.constant 0 : index
    %36 = vector.load %arg12[%c48, %c0_20] : memref<288x256xf32, #tpu.memory_space<vmem>>, vector<8x256xf32>
    tpu.vector_store %arg12[%c48, %c0_20], %35 {strides = array<i32>} : memref<288x256xf32, #tpu.memory_space<vmem>>, vector<8x256xf32>,
    %c240_i32 = arith.constant 240 : i32
    %37 = tpu.dynamic_rotate %0 by %c240_i32 dim 1 : vector<8x256xf32>, i32 -> vector<8x256xf32>
    %c7 = arith.constant 7 : index
    %c0_21 = arith.constant 0 : index
    %38 = vector.load %arg1[%c7, %c0_21] : memref<9x256xf32, #tpu.memory_space<vmem>>, vector<1x256xf32>
    %39 = vector.broadcast %38 : vector<1x256xf32> to vector<8x256xf32>
    %40 = arith.mulf %37, %39 : vector<8x256xf32>
    %c56 = arith.constant 56 : index
    %c0_22 = arith.constant 0 : index
    %41 = vector.load %arg12[%c56, %c0_22] : memref<288x256xf32, #tpu.memory_space<vmem>>, vector<8x256xf32>
    tpu.vector_store %arg12[%c56, %c0_22], %40 {strides = array<i32>} : memref<288x256xf32, #tpu.memory_space<vmem>>, vector<8x256xf32>,
    %c239_i32 = arith.constant 239 : i32
    %42 = tpu.dynamic_rotate %0 by %c239_i32 dim 1 : vector<8x256xf32>, i32 -> vector<8x256xf32>
    %c8_23 = arith.constant 8 : index
    %c0_24 = arith.constant 0 : index
    %43 = vector.load %arg1[%c8_23, %c0_24] : memref<9x256xf32, #tpu.memory_space<vmem>>, vector<1x256xf32>
    %44 = vector.broadcast %43 : vector<1x256xf32> to vector<8x256xf32>
    %45 = arith.mulf %42, %44 : vector<8x256xf32>
    %c64 = arith.constant 64 : index
    %c0_25 = arith.constant 0 : index
    %46 = vector.load %arg12[%c64, %c0_25] : memref<288x256xf32, #tpu.memory_space<vmem>>, vector<8x256xf32>
    tpu.vector_store %arg12[%c64, %c0_25], %45 {strides = array<i32>} : memref<288x256xf32, #tpu.memory_space<vmem>>, vector<8x256xf32>,
    %c0_26 = arith.constant 0 : index
    %c0_27 = arith.constant 0 : index
    %47 = vector.load %arg12[%c0_26, %c0_27] : memref<288x256xf32, #tpu.memory_space<vmem>>, vector<72x256xf32>
    %cst = arith.constant dense<0.000000e+00> : vector<16x256xf32>
    %48 = tpu.matmul %1, %47, %cst {dimension_numbers = #tpu.dot_dimension_numbers<[1], [0], [0], [1], [0, 0, 1, 1], [], []>} : vector<16x72xf32>, vector<72x256xf32>, vector<16x256xf32> -> vector<16x256xf32>
    %49 = vector.broadcast %2 : vector<16x1xf32> to vector<16x256xf32>
    %50 = arith.addf %48, %49 : vector<16x256xf32>
    %cst_28 = arith.constant 0.000000e+00 : f32
    %51 = vector.broadcast %cst_28 : f32 to vector<16x256xf32>
    %52 = arith.maximumf %50, %51 : vector<16x256xf32>
    %c0_29 = arith.constant 0 : index
    %c0_30 = arith.constant 0 : index
    %53 = vector.load %arg9[%c0_29, %c0_30] : memref<16x256xf32, #tpu.memory_space<vmem>>, vector<16x256xf32>
    tpu.vector_store %arg9[%c0_29, %c0_30], %52 {strides = array<i32>} : memref<16x256xf32, #tpu.memory_space<vmem>>, vector<16x256xf32>,
    %c0_31 = arith.constant 0 : index
    %c0_32 = arith.constant 0 : index
    %54 = vector.load %arg5[%c0_31, %c0_32] : memref<32x144xf32, #tpu.memory_space<vmem>>, vector<32x144xf32>
    %c0_33 = arith.constant 0 : index
    %c0_34 = arith.constant 0 : index
    %55 = vector.load %arg6[%c0_33, %c0_34] : memref<32x1xf32, #tpu.memory_space<vmem>>, vector<32x1xf32>
    %c17_i32_35 = arith.constant 17 : i32
    %56 = tpu.dynamic_rotate %52 by %c17_i32_35 dim 1 : vector<16x256xf32>, i32 -> vector<16x256xf32>
    %c0_36 = arith.constant 0 : index
    %c0_37 = arith.constant 0 : index
    %57 = vector.load %arg1[%c0_36, %c0_37] : memref<9x256xf32, #tpu.memory_space<vmem>>, vector<1x256xf32>
    %58 = vector.broadcast %57 : vector<1x256xf32> to vector<16x256xf32>
    %59 = arith.mulf %56, %58 : vector<16x256xf32>
    %c0_38 = arith.constant 0 : index
    %c0_39 = arith.constant 0 : index
    %60 = vector.load %arg12[%c0_38, %c0_39] : memref<288x256xf32, #tpu.memory_space<vmem>>, vector<16x256xf32>
    tpu.vector_store %arg12[%c0_38, %c0_39], %59 {strides = array<i32>} : memref<288x256xf32, #tpu.memory_space<vmem>>, vector<16x256xf32>,
    %c16_i32_40 = arith.constant 16 : i32
    %61 = tpu.dynamic_rotate %52 by %c16_i32_40 dim 1 : vector<16x256xf32>, i32 -> vector<16x256xf32>
    %c1_41 = arith.constant 1 : index
    %c0_42 = arith.constant 0 : index
    %62 = vector.load %arg1[%c1_41, %c0_42] : memref<9x256xf32, #tpu.memory_space<vmem>>, vector<1x256xf32>
    %63 = vector.broadcast %62 : vector<1x256xf32> to vector<16x256xf32>
    %64 = arith.mulf %61, %63 : vector<16x256xf32>
    %c16_43 = arith.constant 16 : index
    %c0_44 = arith.constant 0 : index
    %65 = vector.load %arg12[%c16_43, %c0_44] : memref<288x256xf32, #tpu.memory_space<vmem>>, vector<16x256xf32>
    tpu.vector_store %arg12[%c16_43, %c0_44], %64 {strides = array<i32>} : memref<288x256xf32, #tpu.memory_space<vmem>>, vector<16x256xf32>,
    %c15_i32_45 = arith.constant 15 : i32
    %66 = tpu.dynamic_rotate %52 by %c15_i32_45 dim 1 : vector<16x256xf32>, i32 -> vector<16x256xf32>
    %c2_46 = arith.constant 2 : index
    %c0_47 = arith.constant 0 : index
    %67 = vector.load %arg1[%c2_46, %c0_47] : memref<9x256xf32, #tpu.memory_space<vmem>>, vector<1x256xf32>
    %68 = vector.broadcast %67 : vector<1x256xf32> to vector<16x256xf32>
    %69 = arith.mulf %66, %68 : vector<16x256xf32>
    %c32_48 = arith.constant 32 : index
    %c0_49 = arith.constant 0 : index
    %70 = vector.load %arg12[%c32_48, %c0_49] : memref<288x256xf32, #tpu.memory_space<vmem>>, vector<16x256xf32>
    tpu.vector_store %arg12[%c32_48, %c0_49], %69 {strides = array<i32>} : memref<288x256xf32, #tpu.memory_space<vmem>>, vector<16x256xf32>,
    %c1_i32_50 = arith.constant 1 : i32
    %71 = tpu.dynamic_rotate %52 by %c1_i32_50 dim 1 : vector<16x256xf32>, i32 -> vector<16x256xf32>
    %c3_51 = arith.constant 3 : index
    %c0_52 = arith.constant 0 : index
    %72 = vector.load %arg1[%c3_51, %c0_52] : memref<9x256xf32, #tpu.memory_space<vmem>>, vector<1x256xf32>
    %73 = vector.broadcast %72 : vector<1x256xf32> to vector<16x256xf32>
    %74 = arith.mulf %71, %73 : vector<16x256xf32>
    %c48_53 = arith.constant 48 : index
    %c0_54 = arith.constant 0 : index
    %75 = vector.load %arg12[%c48_53, %c0_54] : memref<288x256xf32, #tpu.memory_space<vmem>>, vector<16x256xf32>
    tpu.vector_store %arg12[%c48_53, %c0_54], %74 {strides = array<i32>} : memref<288x256xf32, #tpu.memory_space<vmem>>, vector<16x256xf32>,
    %c4_55 = arith.constant 4 : index
    %c0_56 = arith.constant 0 : index
    %76 = vector.load %arg1[%c4_55, %c0_56] : memref<9x256xf32, #tpu.memory_space<vmem>>, vector<1x256xf32>
    %77 = vector.broadcast %76 : vector<1x256xf32> to vector<16x256xf32>
    %78 = arith.mulf %52, %77 : vector<16x256xf32>
    %c64_57 = arith.constant 64 : index
    %c0_58 = arith.constant 0 : index
    %79 = vector.load %arg12[%c64_57, %c0_58] : memref<288x256xf32, #tpu.memory_space<vmem>>, vector<16x256xf32>
    tpu.vector_store %arg12[%c64_57, %c0_58], %78 {strides = array<i32>} : memref<288x256xf32, #tpu.memory_space<vmem>>, vector<16x256xf32>,
    %c255_i32_59 = arith.constant 255 : i32
    %80 = tpu.dynamic_rotate %52 by %c255_i32_59 dim 1 : vector<16x256xf32>, i32 -> vector<16x256xf32>
    %c5_60 = arith.constant 5 : index
    %c0_61 = arith.constant 0 : index
    %81 = vector.load %arg1[%c5_60, %c0_61] : memref<9x256xf32, #tpu.memory_space<vmem>>, vector<1x256xf32>
    %82 = vector.broadcast %81 : vector<1x256xf32> to vector<16x256xf32>
    %83 = arith.mulf %80, %82 : vector<16x256xf32>
    %c80 = arith.constant 80 : index
    %c0_62 = arith.constant 0 : index
    %84 = vector.load %arg12[%c80, %c0_62] : memref<288x256xf32, #tpu.memory_space<vmem>>, vector<16x256xf32>
    tpu.vector_store %arg12[%c80, %c0_62], %83 {strides = array<i32>} : memref<288x256xf32, #tpu.memory_space<vmem>>, vector<16x256xf32>,
    %c241_i32_63 = arith.constant 241 : i32
    %85 = tpu.dynamic_rotate %52 by %c241_i32_63 dim 1 : vector<16x256xf32>, i32 -> vector<16x256xf32>
    %c6_64 = arith.constant 6 : index
    %c0_65 = arith.constant 0 : index
    %86 = vector.load %arg1[%c6_64, %c0_65] : memref<9x256xf32, #tpu.memory_space<vmem>>, vector<1x256xf32>
    %87 = vector.broadcast %86 : vector<1x256xf32> to vector<16x256xf32>
    %88 = arith.mulf %85, %87 : vector<16x256xf32>
    %c96 = arith.constant 96 : index
    %c0_66 = arith.constant 0 : index
    %89 = vector.load %arg12[%c96, %c0_66] : memref<288x256xf32, #tpu.memory_space<vmem>>, vector<16x256xf32>
    tpu.vector_store %arg12[%c96, %c0_66], %88 {strides = array<i32>} : memref<288x256xf32, #tpu.memory_space<vmem>>, vector<16x256xf32>,
    %c240_i32_67 = arith.constant 240 : i32
    %90 = tpu.dynamic_rotate %52 by %c240_i32_67 dim 1 : vector<16x256xf32>, i32 -> vector<16x256xf32>
    %c7_68 = arith.constant 7 : index
    %c0_69 = arith.constant 0 : index
    %91 = vector.load %arg1[%c7_68, %c0_69] : memref<9x256xf32, #tpu.memory_space<vmem>>, vector<1x256xf32>
    %92 = vector.broadcast %91 : vector<1x256xf32> to vector<16x256xf32>
    %93 = arith.mulf %90, %92 : vector<16x256xf32>
    %c112 = arith.constant 112 : index
    %c0_70 = arith.constant 0 : index
    %94 = vector.load %arg12[%c112, %c0_70] : memref<288x256xf32, #tpu.memory_space<vmem>>, vector<16x256xf32>
    tpu.vector_store %arg12[%c112, %c0_70], %93 {strides = array<i32>} : memref<288x256xf32, #tpu.memory_space<vmem>>, vector<16x256xf32>,
    %c239_i32_71 = arith.constant 239 : i32
    %95 = tpu.dynamic_rotate %52 by %c239_i32_71 dim 1 : vector<16x256xf32>, i32 -> vector<16x256xf32>
    %c8_72 = arith.constant 8 : index
    %c0_73 = arith.constant 0 : index
    %96 = vector.load %arg1[%c8_72, %c0_73] : memref<9x256xf32, #tpu.memory_space<vmem>>, vector<1x256xf32>
    %97 = vector.broadcast %96 : vector<1x256xf32> to vector<16x256xf32>
    %98 = arith.mulf %95, %97 : vector<16x256xf32>
    %c128 = arith.constant 128 : index
    %c0_74 = arith.constant 0 : index
    %99 = vector.load %arg12[%c128, %c0_74] : memref<288x256xf32, #tpu.memory_space<vmem>>, vector<16x256xf32>
    tpu.vector_store %arg12[%c128, %c0_74], %98 {strides = array<i32>} : memref<288x256xf32, #tpu.memory_space<vmem>>, vector<16x256xf32>,
    %c0_75 = arith.constant 0 : index
    %c0_76 = arith.constant 0 : index
    %100 = vector.load %arg12[%c0_75, %c0_76] : memref<288x256xf32, #tpu.memory_space<vmem>>, vector<144x256xf32>
    %cst_77 = arith.constant dense<0.000000e+00> : vector<32x256xf32>
    %101 = tpu.matmul %54, %100, %cst_77 {dimension_numbers = #tpu.dot_dimension_numbers<[1], [0], [0], [1], [0, 0, 1, 1], [], []>} : vector<32x144xf32>, vector<144x256xf32>, vector<32x256xf32> -> vector<32x256xf32>
    %102 = vector.broadcast %55 : vector<32x1xf32> to vector<32x256xf32>
    %103 = arith.addf %101, %102 : vector<32x256xf32>
    %cst_78 = arith.constant 0.000000e+00 : f32
    %104 = vector.broadcast %cst_78 : f32 to vector<32x256xf32>
    %105 = arith.maximumf %103, %104 : vector<32x256xf32>
    %c0_79 = arith.constant 0 : index
    %c0_80 = arith.constant 0 : index
    %106 = vector.load %arg10[%c0_79, %c0_80] : memref<32x256xf32, #tpu.memory_space<vmem>>, vector<32x256xf32>
    tpu.vector_store %arg10[%c0_79, %c0_80], %105 {strides = array<i32>} : memref<32x256xf32, #tpu.memory_space<vmem>>, vector<32x256xf32>,
    %c0_81 = arith.constant 0 : index
    %c0_82 = arith.constant 0 : index
    %107 = vector.load %arg7[%c0_81, %c0_82] : memref<1x288xf32, #tpu.memory_space<vmem>>, vector<1x288xf32>
    %c0_83 = arith.constant 0 : index
    %c0_84 = arith.constant 0 : index
    %108 = vector.load %arg8[%c0_83, %c0_84] : memref<1x1xf32, #tpu.memory_space<vmem>>, vector<1x1xf32>
    %c17_i32_85 = arith.constant 17 : i32
    %109 = tpu.dynamic_rotate %105 by %c17_i32_85 dim 1 : vector<32x256xf32>, i32 -> vector<32x256xf32>
    %c0_86 = arith.constant 0 : index
    %c0_87 = arith.constant 0 : index
    %110 = vector.load %arg1[%c0_86, %c0_87] : memref<9x256xf32, #tpu.memory_space<vmem>>, vector<1x256xf32>
    %111 = vector.broadcast %110 : vector<1x256xf32> to vector<32x256xf32>
    %112 = arith.mulf %109, %111 : vector<32x256xf32>
    %c0_88 = arith.constant 0 : index
    %c0_89 = arith.constant 0 : index
    %113 = vector.load %arg12[%c0_88, %c0_89] : memref<288x256xf32, #tpu.memory_space<vmem>>, vector<32x256xf32>
    tpu.vector_store %arg12[%c0_88, %c0_89], %112 {strides = array<i32>} : memref<288x256xf32, #tpu.memory_space<vmem>>, vector<32x256xf32>,
    %c16_i32_90 = arith.constant 16 : i32
    %114 = tpu.dynamic_rotate %105 by %c16_i32_90 dim 1 : vector<32x256xf32>, i32 -> vector<32x256xf32>
    %c1_91 = arith.constant 1 : index
    %c0_92 = arith.constant 0 : index
    %115 = vector.load %arg1[%c1_91, %c0_92] : memref<9x256xf32, #tpu.memory_space<vmem>>, vector<1x256xf32>
    %116 = vector.broadcast %115 : vector<1x256xf32> to vector<32x256xf32>
    %117 = arith.mulf %114, %116 : vector<32x256xf32>
    %c32_93 = arith.constant 32 : index
    %c0_94 = arith.constant 0 : index
    %118 = vector.load %arg12[%c32_93, %c0_94] : memref<288x256xf32, #tpu.memory_space<vmem>>, vector<32x256xf32>
    tpu.vector_store %arg12[%c32_93, %c0_94], %117 {strides = array<i32>} : memref<288x256xf32, #tpu.memory_space<vmem>>, vector<32x256xf32>,
    %c15_i32_95 = arith.constant 15 : i32
    %119 = tpu.dynamic_rotate %105 by %c15_i32_95 dim 1 : vector<32x256xf32>, i32 -> vector<32x256xf32>
    %c2_96 = arith.constant 2 : index
    %c0_97 = arith.constant 0 : index
    %120 = vector.load %arg1[%c2_96, %c0_97] : memref<9x256xf32, #tpu.memory_space<vmem>>, vector<1x256xf32>
    %121 = vector.broadcast %120 : vector<1x256xf32> to vector<32x256xf32>
    %122 = arith.mulf %119, %121 : vector<32x256xf32>
    %c64_98 = arith.constant 64 : index
    %c0_99 = arith.constant 0 : index
    %123 = vector.load %arg12[%c64_98, %c0_99] : memref<288x256xf32, #tpu.memory_space<vmem>>, vector<32x256xf32>
    tpu.vector_store %arg12[%c64_98, %c0_99], %122 {strides = array<i32>} : memref<288x256xf32, #tpu.memory_space<vmem>>, vector<32x256xf32>,
    %c1_i32_100 = arith.constant 1 : i32
    %124 = tpu.dynamic_rotate %105 by %c1_i32_100 dim 1 : vector<32x256xf32>, i32 -> vector<32x256xf32>
    %c3_101 = arith.constant 3 : index
    %c0_102 = arith.constant 0 : index
    %125 = vector.load %arg1[%c3_101, %c0_102] : memref<9x256xf32, #tpu.memory_space<vmem>>, vector<1x256xf32>
    %126 = vector.broadcast %125 : vector<1x256xf32> to vector<32x256xf32>
    %127 = arith.mulf %124, %126 : vector<32x256xf32>
    %c96_103 = arith.constant 96 : index
    %c0_104 = arith.constant 0 : index
    %128 = vector.load %arg12[%c96_103, %c0_104] : memref<288x256xf32, #tpu.memory_space<vmem>>, vector<32x256xf32>
    tpu.vector_store %arg12[%c96_103, %c0_104], %127 {strides = array<i32>} : memref<288x256xf32, #tpu.memory_space<vmem>>, vector<32x256xf32>,
    %c4_105 = arith.constant 4 : index
    %c0_106 = arith.constant 0 : index
    %129 = vector.load %arg1[%c4_105, %c0_106] : memref<9x256xf32, #tpu.memory_space<vmem>>, vector<1x256xf32>
    %130 = vector.broadcast %129 : vector<1x256xf32> to vector<32x256xf32>
    %131 = arith.mulf %105, %130 : vector<32x256xf32>
    %c128_107 = arith.constant 128 : index
    %c0_108 = arith.constant 0 : index
    %132 = vector.load %arg12[%c128_107, %c0_108] : memref<288x256xf32, #tpu.memory_space<vmem>>, vector<32x256xf32>
    tpu.vector_store %arg12[%c128_107, %c0_108], %131 {strides = array<i32>} : memref<288x256xf32, #tpu.memory_space<vmem>>, vector<32x256xf32>,
    %c255_i32_109 = arith.constant 255 : i32
    %133 = tpu.dynamic_rotate %105 by %c255_i32_109 dim 1 : vector<32x256xf32>, i32 -> vector<32x256xf32>
    %c5_110 = arith.constant 5 : index
    %c0_111 = arith.constant 0 : index
    %134 = vector.load %arg1[%c5_110, %c0_111] : memref<9x256xf32, #tpu.memory_space<vmem>>, vector<1x256xf32>
    %135 = vector.broadcast %134 : vector<1x256xf32> to vector<32x256xf32>
    %136 = arith.mulf %133, %135 : vector<32x256xf32>
    %c160 = arith.constant 160 : index
    %c0_112 = arith.constant 0 : index
    %137 = vector.load %arg12[%c160, %c0_112] : memref<288x256xf32, #tpu.memory_space<vmem>>, vector<32x256xf32>
    tpu.vector_store %arg12[%c160, %c0_112], %136 {strides = array<i32>} : memref<288x256xf32, #tpu.memory_space<vmem>>, vector<32x256xf32>,
    %c241_i32_113 = arith.constant 241 : i32
    %138 = tpu.dynamic_rotate %105 by %c241_i32_113 dim 1 : vector<32x256xf32>, i32 -> vector<32x256xf32>
    %c6_114 = arith.constant 6 : index
    %c0_115 = arith.constant 0 : index
    %139 = vector.load %arg1[%c6_114, %c0_115] : memref<9x256xf32, #tpu.memory_space<vmem>>, vector<1x256xf32>
    %140 = vector.broadcast %139 : vector<1x256xf32> to vector<32x256xf32>
    %141 = arith.mulf %138, %140 : vector<32x256xf32>
    %c192 = arith.constant 192 : index
    %c0_116 = arith.constant 0 : index
    %142 = vector.load %arg12[%c192, %c0_116] : memref<288x256xf32, #tpu.memory_space<vmem>>, vector<32x256xf32>
    tpu.vector_store %arg12[%c192, %c0_116], %141 {strides = array<i32>} : memref<288x256xf32, #tpu.memory_space<vmem>>, vector<32x256xf32>,
    %c240_i32_117 = arith.constant 240 : i32
    %143 = tpu.dynamic_rotate %105 by %c240_i32_117 dim 1 : vector<32x256xf32>, i32 -> vector<32x256xf32>
    %c7_118 = arith.constant 7 : index
    %c0_119 = arith.constant 0 : index
    %144 = vector.load %arg1[%c7_118, %c0_119] : memref<9x256xf32, #tpu.memory_space<vmem>>, vector<1x256xf32>
    %145 = vector.broadcast %144 : vector<1x256xf32> to vector<32x256xf32>
    %146 = arith.mulf %143, %145 : vector<32x256xf32>
    %c224 = arith.constant 224 : index
    %c0_120 = arith.constant 0 : index
    %147 = vector.load %arg12[%c224, %c0_120] : memref<288x256xf32, #tpu.memory_space<vmem>>, vector<32x256xf32>
    tpu.vector_store %arg12[%c224, %c0_120], %146 {strides = array<i32>} : memref<288x256xf32, #tpu.memory_space<vmem>>, vector<32x256xf32>,
    %c239_i32_121 = arith.constant 239 : i32
    %148 = tpu.dynamic_rotate %105 by %c239_i32_121 dim 1 : vector<32x256xf32>, i32 -> vector<32x256xf32>
    %c8_122 = arith.constant 8 : index
    %c0_123 = arith.constant 0 : index
    %149 = vector.load %arg1[%c8_122, %c0_123] : memref<9x256xf32, #tpu.memory_space<vmem>>, vector<1x256xf32>
    %150 = vector.broadcast %149 : vector<1x256xf32> to vector<32x256xf32>
    %151 = arith.mulf %148, %150 : vector<32x256xf32>
    %c256 = arith.constant 256 : index
    %c0_124 = arith.constant 0 : index
    %152 = vector.load %arg12[%c256, %c0_124] : memref<288x256xf32, #tpu.memory_space<vmem>>, vector<32x256xf32>
    tpu.vector_store %arg12[%c256, %c0_124], %151 {strides = array<i32>} : memref<288x256xf32, #tpu.memory_space<vmem>>, vector<32x256xf32>,
    %c0_125 = arith.constant 0 : index
    %c0_126 = arith.constant 0 : index
    %153 = vector.load %arg12[%c0_125, %c0_126] : memref<288x256xf32, #tpu.memory_space<vmem>>, vector<288x256xf32>
    %cst_127 = arith.constant dense<0.000000e+00> : vector<1x256xf32>
    %154 = tpu.matmul %107, %153, %cst_127 {dimension_numbers = #tpu.dot_dimension_numbers<[1], [0], [0], [1], [0, 0, 1, 1], [], []>} : vector<1x288xf32>, vector<288x256xf32>, vector<1x256xf32> -> vector<1x256xf32>
    %155 = vector.broadcast %108 : vector<1x1xf32> to vector<1x256xf32>
    %156 = arith.addf %154, %155 : vector<1x256xf32>
    %cst_128 = arith.constant 0.000000e+00 : f32
    %157 = vector.broadcast %cst_128 : f32 to vector<1x256xf32>
    %158 = arith.maximumf %156, %157 : vector<1x256xf32>
    %c0_129 = arith.constant 0 : index
    %c0_130 = arith.constant 0 : index
    %159 = vector.load %arg11[%c0_129, %c0_130] : memref<1x256xf32, #tpu.memory_space<vmem>>, vector<1x256xf32>
    tpu.vector_store %arg11[%c0_129, %c0_130], %158 {strides = array<i32>} : memref<1x256xf32, #tpu.memory_space<vmem>>, vector<1x256xf32>,
    return
  }
  func.func @transform_0(%arg0: i32) -> (i32, i32) {
    %c0_i32 = arith.constant 0 : i32
    %c0_i32_0 = arith.constant 0 : i32
    %c0_i32_1 = arith.constant 0 : i32
    return %c0_i32, %c0_i32_0 : i32, i32
  }
  func.func @transform_1(%arg0: i32) -> (i32, i32) {
    %c0_i32 = arith.constant 0 : i32
    %c0_i32_0 = arith.constant 0 : i32
    return %c0_i32, %arg0 : i32, i32
  }
  func.func @transform_2(%arg0: i32) -> (i32, i32) {
    %c0_i32 = arith.constant 0 : i32
    %c0_i32_0 = arith.constant 0 : i32
    %c0_i32_1 = arith.constant 0 : i32
    return %c0_i32, %c0_i32_0 : i32, i32
  }
  func.func @transform_3(%arg0: i32) -> (i32, i32) {
    %c0_i32 = arith.constant 0 : i32
    %c0_i32_0 = arith.constant 0 : i32
    %c0_i32_1 = arith.constant 0 : i32
    return %c0_i32, %c0_i32_0 : i32, i32
  }
  func.func @transform_4(%arg0: i32) -> (i32, i32) {
    %c0_i32 = arith.constant 0 : i32
    %c0_i32_0 = arith.constant 0 : i32
    %c0_i32_1 = arith.constant 0 : i32
    return %c0_i32, %c0_i32_0 : i32, i32
  }
  func.func @transform_5(%arg0: i32) -> (i32, i32) {
    %c0_i32 = arith.constant 0 : i32
    %c0_i32_0 = arith.constant 0 : i32
    %c0_i32_1 = arith.constant 0 : i32
    return %c0_i32, %c0_i32_0 : i32, i32
  }
  func.func @transform_6(%arg0: i32) -> (i32, i32) {
    %c0_i32 = arith.constant 0 : i32
    %c0_i32_0 = arith.constant 0 : i32
    %c0_i32_1 = arith.constant 0 : i32
    return %c0_i32, %c0_i32_0 : i32, i32
  }
  func.func @transform_7(%arg0: i32) -> (i32, i32) {
    %c0_i32 = arith.constant 0 : i32
    %c0_i32_0 = arith.constant 0 : i32
    %c0_i32_1 = arith.constant 0 : i32
    return %c0_i32, %c0_i32_0 : i32, i32
  }
  func.func @transform_8(%arg0: i32) -> (i32, i32) {
    %c0_i32 = arith.constant 0 : i32
    %c0_i32_0 = arith.constant 0 : i32
    return %c0_i32, %arg0 : i32, i32
  }
  func.func @transform_9(%arg0: i32) -> (i32, i32) {
    %c0_i32 = arith.constant 0 : i32
    %c0_i32_0 = arith.constant 0 : i32
    return %c0_i32, %arg0 : i32, i32
  }
  func.func @transform_10(%arg0: i32) -> (i32, i32) {
    %c0_i32 = arith.constant 0 : i32
    %c0_i32_0 = arith.constant 0 : i32
    return %c0_i32, %arg0 : i32, i32
  }
}

</mosaic_0001>

<bundles_post_ra>
// kernel: edge_net_forward.1
= control target key start
LH: loop header
LB: loop body
LE: loop exit
PB: predicated region body
PF: predicated region fallthrough
CT: control target
= control target key end

     0   :  { %s2987_s0 = inlined_call_operand.vmem [shape: f32[9,256], index: 0, kind: input, shape index: {}]   ;;  %s2988_s1 = inlined_call_operand.vmem [shape: f32[8,512], index: 1, kind: input, shape index: {}]   ;;  %s2989_s2 = inlined_call_operand.vmem [shape: f32[16,72], index: 2, kind: input, shape index: {}]   ;;  %s2990_s3 = inlined_call_operand.vmem [shape: f32[16,1], index: 3, kind: input, shape index: {}]   ;;  %s2991_s4 = inlined_call_operand.vmem [shape: f32[32,144], index: 4, kind: input, shape index: {}]   ;;  %s2992_s5 = inlined_call_operand.vmem [shape: f32[32,1], index: 5, kind: input, shape index: {}]   ;;  %s2993_s6 = inlined_call_operand.vmem [shape: f32[1,288], index: 6, kind: input, shape index: {}]   ;;  %s2994_s7 = inlined_call_operand.<no memory space> [shape: f32[1,1], index: 7, kind: input, shape index: {}]   ;;  %s2995_s8 = inlined_call_operand.vmem [shape: f32[16,512], index: 8, kind: output, shape index: {0}]   ;;  %s2996_s9 = inlined_call_operand.vmem [shape: f32[32,512], index: 9, kind: output, shape index: {1}]   ;;  %s2997_s10 = inlined_call_operand.vmem [shape: f32[1,512], index: 10, kind: output, shape index: {2}]  }
   0x1   :  { %v16_v0 = vstv %s2994_s7 }
   0x2   :  { %17 = vst [vmem:[#allocation3] sm:$0x1] %v16_v0 }
   0x3   :  { %s2041_s15 = smov 0   ;;  %s2043_s16 = smov 0  }
   0x4   :  { %s2045_s17 = smov 0  }
   0x5 LB: > { %s2054_s7 = sadd.s32 4294967295, %s1972_s17   ;;  %s2056_s18 = sadd.s32 1, %s1972_s17   ;;  %s1972_s17 = sphi %s2045_s17, %s3033_s17   ;;  %s1968_s16 = sphi %s2043_s16, %s3032_s16   ;;  %s1964_s15 = sphi %s2041_s15, %s3031_s15  }
   0x6   : > { %s200_s19 = ssub.s32 %s1972_s17, %s2056_s18  ;;  %s203_s20 = sadd.s32 1, %s1968_s16 }
   0x7   : > { %p201_p0 = scmp.eq.s32.totalorder %s200_s19, 0  ;;  %p213_p1 = scmp.ne.s32.totalorder %s1968_s16, %s1964_s15 }
   0x8   : > { %p214_p2 = scmp.eq.s32.totalorder %s2054_s7, 1  ;;  %p1860_p3 = scmp.ge.s32.totalorder %s1972_s17, 1 }
   0x9   : > { %s2064_s21 = scalar_select %p201_p0, %s1968_s16, %s203_s20  }
   0xa   : > { %p2066_p4 = por %p214_p2, %p213_p1  ;;  %p320_p5 = scmp.lt.s32.totalorder %s1972_s17, 3 }
   0xc   : > { %p321_p6 = pnand %p1860_p3, %p320_p5 }
   0xe   : > { %324 = sbr.rel (%p321_p6) target bundleno = 1093 (0x445), region = 52 }
  0x13   : > { %s1863_s23 = sshll.u32 %s2054_s7, 1  ;;  %s1974_s28 = smov 112   ;;  %v3008_v4 = vlaneseq  ;;  %v1873_v8 = vld [vmem:[%s2987_s0 + $0x10] ss:$8 sm:$0x3]  ;;  %v382_v50 = vld [vmem:[%s2990_s3] sm:$0xff] }
  0x14   : > { %p366_p7 = scmp.lt.s32.totalorder %s1863_s23, 3  ;;  %s3002_s29 = smov 111   ;;  %v1872_v10 = vld [vmem:[%s2987_s0 + $0x7] ss:$8 sm:$0x3]  ;;  %v532_v11 = vperm.slane %v1873_v8, 0 }
  0x15   : > { %s3006_s30 = smov 113   ;;  %s3004_s11 = smov 127   ;;  %v2114_v7 = vand.u32 127, %v3008_v4  ;;  %v533_v12 = vperm.slane %v1873_v8, 1  ;;  %v514_v16 = vperm.slane %v1872_v10, 0  ;;  %v515_v17 = vperm.slane %v1872_v10, 1 }
  0x16   : > { %s3035_s23 = smov (!%p366_p7, %s1863_s23), 3  ;;  %s1978_s12 = smov 1   ;;  %v1871_v13 = vld [vmem:[%s2987_s0 + $0x6] ss:$8 sm:$0x3]  ;;  %v1982_v56 = vmov 0  }
  0x17   : > { %s1864_s24 = sshll.u32 %s3035_s23, 3  ;;  %s1979_s13 = smov 15   ;;  %vm508_vm0 = vcmp.lt.s32.totalorder %v2114_v7, 112  ;;  %vm526_vm1 = vcmp.lt.s32.totalorder %v2114_v7, 111  ;;  %vm490_vm2 = vcmp.lt.s32.totalorder %v2114_v7, 113  ;;  %v496_v24 = vperm.slane %v1871_v13, 0  ;;  %1948 = vset.pattern.permute.xlu2 %v1982_v56  ;;  %1947 = vset.pattern.permute.xlu1 %v1982_v56 }
  0x18   : > { %s369_s27 = scalar_lea.vmem %s2988_s1, %s1864_s24  ;;  %s3000_s14 = smov 16   ;;  %v497_v25 = vperm.slane %v1871_v13, 1  ;;  %v1870_v26 = vld [vmem:[%s2987_s0 + $0x5] ss:$8 sm:$0x3]  ;;  %vm472_vm3 = vcmp.lt.s32.totalorder %v2114_v7, 127  ;;  %1949 = vset.pattern.permute.xlu0 %v1982_v56 }
  0x19   : > { %v2077_v1 = vld [vmem:[%s369_s27] sm:$0xff]  ;;  %v2085_v2 = vld [vmem:[%s369_s27 + $0x8] sm:$0xff]  ;;  %s2998_s17 = smov 17   ;;  %v478_v33 = vperm.slane %v1870_v26, 0  ;;  %v479_v34 = vperm.slane %v1870_v26, 1  ;;  %vm443_vm4 = vcmp.lt.s32.totalorder %v2114_v7, 1 }
  0x1a   : > { %504 = vrot.lane.b32.xlu1 %v2077_v1, %s1974_s28  ;;  %522 = vrot.lane.b32.xlu0 %v2077_v1, %s3002_s29  ;;  %v1869_v29 = vld [vmem:[%s2987_s0 + $0x4] ss:$8 sm:$0x3]  ;;  %v1868_v47 = vld [vmem:[%s2987_s0 + $0x3] ss:$8 sm:$0x3] }
  0x1b   : > { %486 = vrot.lane.b32.xlu2 %v2077_v1, %s3006_s30  ;;  %v460_v37 = vperm.slane %v1869_v29, 0  ;;  %v461_v38 = vperm.slane %v1869_v29, 1  ;;  %v1867_v48 = vld [vmem:[%s2987_s0 + $0x2] ss:$8 sm:$0x3]  ;;  %v449_v49 = vperm.slane %v1868_v47, 0 }
  0x1c   : > { %v383_v51 = vld [vmem:[%s2990_s3 + $0x8] sm:$0xff]  ;;  %v450_v52 = vperm.slane %v1868_v47, 1  ;;  %vm425_vm5 = vcmp.lt.s32.totalorder %v2114_v7, 15  ;;  %v431_v54 = vperm.slane %v1867_v48, 0  ;;  %v432_v55 = vperm.slane %v1867_v48, 1  ;;  %s3015_s27 = smov 16  }
  0x1d   : > { %v464_v45 = vmul.f32 %v460_v37, %v2077_v1  ;;  %v465_v46 = vmul.f32 %v461_v38, %v2085_v2  ;;  %vm407_vm6 = vcmp.lt.s32.totalorder %v2114_v7, 16  ;;  %vm390_vm7 = vcmp.lt.s32.totalorder %v2114_v7, 17  ;;  %s3016_s19 = smov 17  }
  0x1e   : > { %vm568_vm8 = vcmask 588800   ;;  %vm919_vm9 = vcmask 130048   ;;  %vm1540_vm10 = vcmask 261120   ;;  %vm1668_vm11 = vcmask 1040384  }
  0x22   : > { %506 = vrot.lane.b32.xlu1 %v2085_v2, %s1974_s28  ;;  %524 = vrot.lane.b32.xlu0 %v2085_v2, %s3002_s29 }
  0x23   : > { %488 = vrot.lane.b32.xlu2 %v2085_v2, %s3006_s30 }
  0x2a   : > { %470 = vrot.lane.b32.xlu1 %v2085_v2, %s3004_s11  ;;  %468 = vrot.lane.b32.xlu0 %v2077_v1, %s3004_s11 }
  0x2b   : > { %439 = vrot.lane.b32.xlu2 %v2077_v1, %s1978_s12 }
  0x32   : > { %421 = vrot.lane.b32.xlu1 %v2077_v1, %s1979_s13  ;;  %441 = vrot.lane.b32.xlu0 %v2085_v2, %s1978_s12 }
  0x33   : > { %423 = vrot.lane.b32.xlu2 %v2085_v2, %s1979_s13 }
  0x3a   : > { %405 = vrot.lane.b32.xlu1 %v2085_v2, %s3000_s14  ;;  %403 = vrot.lane.b32.xlu0 %v2077_v1, %s3000_s14  ;;  %s350_s14 = sand.u32 1, %s1964_s15   ;;  %s3021_s15 = smov 113  }
  0x3b   : > { %384 = vrot.lane.b32.xlu2 %v2077_v1, %s2998_s17 }
  0x42   : > { %386 = vrot.lane.b32.xlu0 %v2085_v2, %s2998_s17  ;;  %565 = vperm.xlu1 %1947, %v383_v51   ;;  %s1861_s17 = sshll.u32 %s350_s14, 5 }
  0x43   : > { %560 = vperm.xlu2 %1948, %v382_v50   ;;  %s2204_s26 = scalar_lea.vmem [#allocation4], %s1861_s17  ;;  %s1862_s17 = sshll.u32 %s350_s14, 6 }
  0x44   : > { %s3023_s14 = smov 127  }
  0x75   : > { %v487_v3 = vpop.permute.xlu2 %486 }
  0x7d   : > { %v489_v9 = vpop.permute.xlu2 %488 }
  0x7e   : > { %v491_v27 = vsel %vm490_vm2, %v487_v3, %v489_v9  ;;  %v492_v28 = vsel %vm490_vm2, %v489_v9, %v487_v3  ;;  %v1866_v3 = vld [vmem:[%s2987_s0 + $0x1] ss:$8 sm:$0x3] }
  0x7f   : > { %v500_v35 = vmul.f32 %v496_v24, %v491_v27  ;;  %v501_v36 = vmul.f32 %v497_v25, %v492_v28  ;;  %v381_v24 = vld [vmem:[%s2989_s2 + $0x8] sm:$0xff] }
  0x85   : > { %v440_v32 = vpop.permute.xlu2 %439 }
  0x8c   : > { %v505_v5 = vpop.permute.xlu1 %504  ;;  %v523_v6 = vpop.permute.xlu0 %522 }
  0x8d   : > { %v424_v53 = vpop.permute.xlu2 %423 }
  0x94   : > { %v507_v14 = vpop.permute.xlu1 %506  ;;  %v525_v15 = vpop.permute.xlu0 %524 }
  0x95   : > { %v509_v18 = vsel %vm508_vm0, %v505_v5, %v507_v14  ;;  %v510_v19 = vsel %vm508_vm0, %v507_v14, %v505_v5  ;;  %v527_v20 = vsel %vm526_vm1, %v523_v6, %v525_v15  ;;  %v528_v21 = vsel %vm526_vm1, %v525_v15, %v523_v6  ;;  %v393_v14 = vld [vmem:[%s2987_s0] ss:$8 sm:$0x3]  ;;  %v385_v15 = vpop.permute.xlu2 %384 }
  0x96   : > { %v536_v22 = vmul.f32 %v532_v11, %v527_v20  ;;  %v537_v23 = vmul.f32 %v533_v12, %v528_v21  ;;  %v518_v30 = vmul.f32 %v514_v16, %v509_v18  ;;  %v519_v31 = vmul.f32 %v515_v17, %v510_v19 }
  0x97   : > { %v413_v5 = vperm.slane %v1866_v3, 0  ;;  %v414_v6 = vperm.slane %v1866_v3, 1  ;;  %v395_v16 = vperm.slane %v393_v14, 0  ;;  %v396_v17 = vperm.slane %v393_v14, 1 }
  0x98   : > { %582 = vmatpush.msra.mxu0 %v536_v22  ;;  %605 = vmatpush.msra.mxu1 %v537_v23  ;;  %v380_v23 = vld [vmem:[%s2989_s2] sm:$0xff] }
  0x9a   : > { %583 = vmatpush.msra.mxu0 %v518_v30  ;;  %606 = vmatpush.msra.mxu1 %v519_v31 }
  0x9c   : > { %v471_v39 = vpop.permute.xlu1 %470  ;;  %584 = vmatpush.msra.mxu0 %v500_v35  ;;  %607 = vmatpush.msra.mxu1 %v501_v36  ;;  %v469_v40 = vpop.permute.xlu0 %468 }
  0x9d   : > { %v473_v41 = vsel %vm472_vm3, %v469_v40, %v471_v39  ;;  %v474_v42 = vsel %vm472_vm3, %v471_v39, %v469_v40  ;;  %v561_v25 = vpop.permute.xlu2 %560  ;;  %v640_v39 = vld [vmem:[%s2992_s5 + $0x18] sm:$0xff]  ;;  %v638_v40 = vld [vmem:[%s2992_s5 + $0x8] sm:$0xff] }
  0x9e   : > { %v482_v43 = vmul.f32 %v478_v33, %v473_v41  ;;  %v483_v44 = vmul.f32 %v479_v34, %v474_v42  ;;  %v637_v41 = vld [vmem:[%s2992_s5] sm:$0xff] }
  0xa0   : > { %585 = vmatpush.msra.mxu0 %v482_v43  ;;  %608 = vmatpush.msra.mxu1 %v483_v44 }
  0xa2   : > { %586 = vmatpush.msra.mxu0 %v464_v45  ;;  %609 = vmatpush.msra.mxu1 %v465_v46 }
  0xa4   : > { %v422_v57 = vpop.permute.xlu1 %421  ;;  %v442_v58 = vpop.permute.xlu0 %441 }
  0xa5   : > { %v444_v59 = vsel %vm443_vm4, %v440_v32, %v442_v58  ;;  %v445_v60 = vsel %vm443_vm4, %v442_v58, %v440_v32  ;;  %v426_v61 = vsel %vm425_vm5, %v422_v57, %v424_v53  ;;  %v427_v62 = vsel %vm425_vm5, %v424_v53, %v422_v57  ;;  %v1885_v58 = vld [vmem:[%s2987_s0 + $0x10] ss:$8 sm:$0x3] }
  0xa6   : > { %v453_v63 = vmul.f32 %v449_v49, %v445_v60  ;;  %v454_v0 = vmul.f32 %v450_v52, %v444_v59  ;;  %v435_v1 = vmul.f32 %v431_v54, %v427_v62  ;;  %v436_v2 = vmul.f32 %v432_v55, %v426_v61  ;;  %v1884_v59 = vld [vmem:[%s2987_s0 + $0x7] ss:$8 sm:$0x3] }
  0xa7   : > { %v851_v60 = vperm.slane %v1885_v58, 0  ;;  %v826_v14 = vperm.slane %v1884_v59, 1 }
  0xa8   : > { %587 = vmatpush.msra.mxu0 %v453_v63  ;;  %610 = vmatpush.msra.mxu1 %v454_v0 }
  0xaa   : > { %588 = vmatpush.msra.mxu0 %v435_v1  ;;  %611 = vmatpush.msra.mxu1 %v436_v2  ;;  %v825_v1 = vperm.slane %v1884_v59, 0  ;;  %v852_v2 = vperm.slane %v1885_v58, 1  ;;  %v1881_v58 = vld [vmem:[%s2987_s0 + $0x4] ss:$8 sm:$0x3] }
  0xac   : > { %v406_v8 = vpop.permute.xlu1 %405  ;;  %v404_v9 = vpop.permute.xlu0 %403 }
  0xad   : > { %v408_v10 = vsel %vm407_vm6, %v404_v9, %v406_v8  ;;  %v409_v11 = vsel %vm407_vm6, %v406_v8, %v404_v9 }
  0xae   : > { %v417_v12 = vmul.f32 %v413_v5, %v409_v11  ;;  %v418_v13 = vmul.f32 %v414_v6, %v408_v10 }
  0xb0   : > { %589 = vmatpush.msra.mxu0 %v417_v12  ;;  %612 = vmatpush.msra.mxu1 %v418_v13 }
  0xb4   : > { %v387_v18 = vpop.permute.xlu0 %386  ;;  %v566_v32 = vpop.permute.xlu1 %565 }
  0xb5   : > { %v391_v19 = vsel %vm390_vm7, %v385_v15, %v387_v18  ;;  %v392_v20 = vsel %vm390_vm7, %v387_v18, %v385_v15 }
  0xb6   : > { %v399_v21 = vmul.f32 %v395_v16, %v392_v20  ;;  %v400_v22 = vmul.f32 %v396_v17, %v391_v19  ;;  %v1883_v20 = vld [vmem:[%s2987_s0 + $0x6] ss:$8 sm:$0x3] }
  0xb8   : > { %590 = vmatpush.msra.mxu0 %v399_v21  ;;  %613 = vmatpush.msra.mxu1 %v400_v22  ;;  %v630_v21 = vld [vmem:[%s2991_s4 + $0x8] sm:$0xff] }
  0xb9   : > { %1874 = vmatmul.msk.f32.vlgmr.msra.gmra.mxu0 %vm568_vm8, %v380_v23  ;;  %1876 = vmatmul.msk.f32.vlgmr.msra.gmra.mxu1 %vm568_vm8, %v380_v23 }
  0xc1   : > { %1875 = vmatmul.msk.f32.gmra.mxu0 %vm568_vm8, %v381_v24  ;;  %1877 = vmatmul.msk.f32.gmra.mxu1 %vm568_vm8, %v381_v24 }
 0x136   : > { %v592_v26 = vpop.f32.mrf.mxu0  ;;  %v615_v27 = vpop.f32.mrf.mxu1 }
 0x137   : > { %v593_v28 = vadd.f32 %v592_v26, %v561_v25  ;;  %v616_v29 = vadd.f32 %v615_v27, %v561_v25  ;;  %v799_v25 = vperm.slane %v1883_v20, 0  ;;  %v800_v26 = vperm.slane %v1883_v20, 1 }
 0x139   : > { %v2200_v30 = vmax.f32 %v593_v28, 0.0  ;;  %v2202_v31 = vmax.f32 %v616_v29, 0.0 }
 0x13b   : > { %625 = vst [vmem:[%s2204_s26] sm:$0xff] %v2200_v30  ;;  %815 = vrot.lane.b32.xlu1 %v2202_v31, %s1974_s28  ;;  %841 = vrot.lane.b32.xlu0 %v2202_v31, %s3002_s29 }
 0x13c   : > { %626 = vst [vmem:[%s2204_s26 + $0x8] sm:$0xff] %v2202_v31  ;;  %837 = vrot.lane.b32.xlu2 %v2200_v30, %s3002_s29 }
 0x13e   : > { %v595_v33 = vpop.f32.mrf.mxu0  ;;  %v618_v34 = vpop.f32.mrf.mxu1 }
 0x13f   : > { %v596_v35 = vadd.f32 %v595_v33, %v566_v32  ;;  %v619_v36 = vadd.f32 %v618_v34, %v566_v32 }
 0x141   : > { %v2216_v37 = vmax.f32 %v596_v35, 0.0  ;;  %v2218_v38 = vmax.f32 %v619_v36, 0.0 }
 0x143   : > { %785 = vrot.lane.b32.xlu1 %v2200_v30, %s3006_s30  ;;  %811 = vrot.lane.b32.xlu0 %v2200_v30, %s1974_s28  ;;  %627 = vst [vmem:[%s2204_s26 + $0x10] sm:$0xff] %v2216_v37 }
 0x144   : > { %789 = vrot.lane.b32.xlu2 %v2202_v31, %s3006_s30  ;;  %628 = vst [vmem:[%s2204_s26 + $0x18] sm:$0xff] %v2218_v38 }
 0x14b   : > { %723 = vrot.lane.b32.xlu1 %v2202_v31, %s1978_s12  ;;  %763 = vrot.lane.b32.xlu0 %v2202_v31, %s3004_s11 }
 0x14c   : > { %759 = vrot.lane.b32.xlu2 %v2200_v30, %s3004_s11 }
 0x153   : > { %693 = vrot.lane.b32.xlu1 %v2200_v30, %s1979_s13  ;;  %719 = vrot.lane.b32.xlu0 %v2200_v30, %s1978_s12 }
 0x154   : > { %697 = vrot.lane.b32.xlu2 %v2202_v31, %s1979_s13 }
 0x15b   : > { %843 = vrot.lane.b32.xlu1 %v2218_v38, %s3002_s29  ;;  %671 = vrot.lane.b32.xlu0 %v2202_v31, %s3015_s27 }
 0x15c   : > { %667 = vrot.lane.b32.xlu2 %v2200_v30, %s3015_s27 }
 0x163   : > { %813 = vrot.lane.b32.xlu1 %v2216_v37, %s1974_s28  ;;  %839 = vrot.lane.b32.xlu0 %v2216_v37, %s3002_s29 }
 0x164   : > { %817 = vrot.lane.b32.xlu2 %v2218_v38, %s1974_s28 }
 0x16b   : > { %765 = vrot.lane.b32.xlu1 %v2218_v38, %s3004_s11  ;;  %791 = vrot.lane.b32.xlu0 %v2218_v38, %s3006_s30 }
 0x16c   : > { %787 = vrot.lane.b32.xlu2 %v2216_v37, %s3006_s30  ;;  %s2459_s30 = scalar_lea.vmem [#allocation5], %s1862_s17  ;;  %s376_s17 = scalar_lea.vmem %s2997_s10, %s3035_s23 }
 0x173   : > { %721 = vrot.lane.b32.xlu1 %v2216_v37, %s1978_s12  ;;  %761 = vrot.lane.b32.xlu0 %v2216_v37, %s3004_s11 }
 0x174   : > { %725 = vrot.lane.b32.xlu2 %v2218_v38, %s1978_s12 }
 0x17b   : > { %673 = vrot.lane.b32.xlu1 %v2218_v38, %s3015_s27  ;;  %699 = vrot.lane.b32.xlu0 %v2218_v38, %s1979_s13 }
 0x17c   : > { %695 = vrot.lane.b32.xlu2 %v2216_v37, %s1979_s13 }
 0x183   : > { %643 = vrot.lane.b32.xlu1 %v2216_v37, %s3016_s19  ;;  %669 = vrot.lane.b32.xlu0 %v2216_v37, %s3015_s27 }
 0x184   : > { %647 = vrot.lane.b32.xlu2 %v2218_v38, %s3016_s19 }
 0x18b   : > { %645 = vrot.lane.b32.xlu1 %v2202_v31, %s3016_s19  ;;  %641 = vrot.lane.b32.xlu0 %v2200_v30, %s3016_s19 }
 0x18c   : > { %916 = vperm.xlu2 %1948, %v640_v39  }
 0x193   : > { %906 = vperm.xlu1 %1947, %v638_v40   ;;  %v1882_v40 = vld [vmem:[%s2987_s0 + $0x5] ss:$8 sm:$0x3] }
 0x194   : > { %901 = vperm.xlu2 %1948, %v637_v41   ;;  %v632_v41 = vld [vmem:[%s2991_s4 + $0x18] sm:$0xff] }
 0x196   : > { %v838_v42 = vpop.permute.xlu2 %837 }
 0x19e   : > { %v790_v43 = vpop.permute.xlu2 %789 }
 0x1a6   : > { %v2291_v46 = vpop.permute.xlu2 %759 }
 0x1ad   : > { %v816_v44 = vpop.permute.xlu1 %815  ;;  %v842_v45 = vpop.permute.xlu0 %841 }
 0x1ae   : > { %v2293_v49 = vpop.permute.xlu2 %697  ;;  %v845_v61 = vsel %vm526_vm1, %v838_v42, %v842_v45  ;;  %v847_v62 = vsel %vm526_vm1, %v842_v45, %v838_v42  ;;  %v774_v45 = vperm.slane %v1882_v40, 1 }
 0x1af   : > { %v855_v17 = vmul.f32 %v851_v60, %v845_v61  ;;  %v856_v18 = vmul.f32 %v852_v2, %v847_v62 }
 0x1b5   : > { %v786_v47 = vpop.permute.xlu1 %785  ;;  %v812_v48 = vpop.permute.xlu0 %811 }
 0x1b6   : > { %v2299_v52 = vpop.permute.xlu2 %667  ;;  %v819_v3 = vsel %vm508_vm0, %v812_v48, %v816_v44  ;;  %v821_v15 = vsel %vm508_vm0, %v816_v44, %v812_v48  ;;  %v793_v27 = vsel %vm490_vm2, %v786_v47, %v790_v43  ;;  %v795_v28 = vsel %vm490_vm2, %v790_v43, %v786_v47 }
 0x1b7   : > { %v829_v16 = vmul.f32 %v825_v1, %v819_v3  ;;  %v830_v22 = vmul.f32 %v826_v14, %v821_v15  ;;  %v803_v35 = vmul.f32 %v799_v25, %v793_v27  ;;  %v804_v36 = vmul.f32 %v800_v26, %v795_v28 }
 0x1b8   : > { %v773_v44 = vperm.slane %v1882_v40, 0 }
 0x1bd   : > { %v2295_v50 = vpop.permute.xlu1 %723  ;;  %v2297_v51 = vpop.permute.xlu0 %763 }
 0x1be   : > { %v818_v57 = vpop.permute.xlu2 %817  ;;  %v767_v47 = vsel %vm472_vm3, %v2291_v46, %v2297_v51  ;;  %v769_v48 = vsel %vm472_vm3, %v2297_v51, %v2291_v46  ;;  %v1880_v46 = vld [vmem:[%s2987_s0 + $0x3] ss:$8 sm:$0x3] }
 0x1bf   : > { %v777_v61 = vmul.f32 %v773_v44, %v767_v47  ;;  %v778_v62 = vmul.f32 %v774_v45, %v769_v48 }
 0x1c5   : > { %v2301_v53 = vpop.permute.xlu1 %693  ;;  %v2303_v54 = vpop.permute.xlu0 %719 }
 0x1c6   : > { %v788_v13 = vpop.permute.xlu2 %787  ;;  %v703_v20 = vsel %vm425_vm5, %v2293_v49, %v2301_v53 }
 0x1cd   : > { %v844_v55 = vpop.permute.xlu1 %843  ;;  %v2305_v56 = vpop.permute.xlu0 %671 }
 0x1ce   : > { %v726_v39 = vpop.permute.xlu2 %725 }
 0x1d5   : > { %v814_v63 = vpop.permute.xlu1 %813  ;;  %v840_v0 = vpop.permute.xlu0 %839 }
 0x1d6   : > { %v848_v5 = vsel %vm526_vm1, %v844_v55, %v840_v0  ;;  %v820_v6 = vsel %vm508_vm0, %v814_v63, %v818_v57  ;;  %v846_v8 = vsel %vm526_vm1, %v840_v0, %v844_v55  ;;  %v822_v9 = vsel %vm508_vm0, %v818_v57, %v814_v63  ;;  %v696_v3 = vpop.permute.xlu2 %695 }
 0x1d7   : > { %v831_v10 = vmul.f32 %v825_v1, %v820_v6  ;;  %v857_v11 = vmul.f32 %v851_v60, %v846_v8  ;;  %v858_v12 = vmul.f32 %v852_v2, %v848_v5  ;;  %v832_v19 = vmul.f32 %v826_v14, %v822_v9  ;;  %v634_v2 = vld [vmem:[%s2991_s4 + $0x28] sm:$0xff] }
 0x1d8   : > { %v747_v63 = vperm.slane %v1881_v58, 0  ;;  %v748_v0 = vperm.slane %v1881_v58, 1 }
 0x1d9   : > { %932 = vmatpush.msra.mxu2 %v831_v10  ;;  %975 = vmatpush.msra.mxu3 %v857_v11  ;;  %v734_v11 = vperm.slane %v1880_v46, 1 }
 0x1da   : > { %1033 = vmatpush.msrb.mxu0 %v858_v12  ;;  %v753_v51 = vmul.f32 %v747_v63, %v2216_v37  ;;  %v754_v1 = vmul.f32 %v748_v0, %v2218_v38  ;;  %v751_v10 = vmul.f32 %v747_v63, %v2200_v30  ;;  %v752_v37 = vmul.f32 %v748_v0, %v2202_v31  ;;  %v1879_v30 = vld [vmem:[%s2987_s0 + $0x2] ss:$8 sm:$0x3]  ;;  %v631_v63 = vld [vmem:[%s2991_s4 + $0x10] sm:$0xff] }
 0x1db   : > { %933 = vmatpush.msra.mxu2 %v829_v16  ;;  %976 = vmatpush.msra.mxu3 %v855_v17  ;;  %v733_v38 = vperm.slane %v1880_v46, 0  ;;  %v727_v12 = vsel %vm443_vm4, %v2303_v54, %v2295_v50  ;;  %v707_v17 = vperm.slane %v1879_v30, 0  ;;  %v633_v0 = vld [vmem:[%s2991_s4 + $0x20] sm:$0xff]  ;;  %v635_v46 = vld [vmem:[%s2991_s4 + $0x30] sm:$0xff] }
 0x1dc   : > { %1034 = vmatpush.msrb.mxu0 %v856_v18  ;;  %1886 = vmatmul.msk.f32.vlgmr.msra.gmra.mxu3 %vm919_vm9, %v630_v21  ;;  %v708_v18 = vperm.slane %v1879_v30, 1 }
 0x1dd   : > { %990 = vmatpush.msrb.mxu3 %v832_v19  ;;  %v766_v23 = vpop.permute.xlu1 %765  ;;  %v792_v24 = vpop.permute.xlu0 %791  ;;  %1890 = vmatmul.msk.f32.vlgmr.msrb.gmra.mxu0 %vm919_vm9, %v630_v21  ;;  %v701_v19 = vsel %vm425_vm5, %v2301_v53, %v2293_v49  ;;  %v1878_v21 = vld [vmem:[%s2987_s0 + $0x1] ss:$8 sm:$0x3]  ;;  %v711_v49 = vmul.f32 %v707_v17, %v703_v20 }
 0x1de   : > { %v794_v29 = vsel %vm490_vm2, %v788_v13, %v792_v24  ;;  %v796_v32 = vsel %vm490_vm2, %v792_v24, %v788_v13  ;;  %v729_v13 = vsel %vm443_vm4, %v2295_v50, %v2303_v54  ;;  %v738_v54 = vmul.f32 %v734_v11, %v727_v12  ;;  %v636_v24 = vld [vmem:[%s2991_s4 + $0x38] sm:$0xff] }
 0x1df   : > { %991 = vmatpush.msrb.mxu3 %v830_v22  ;;  %v805_v33 = vmul.f32 %v799_v25, %v794_v29  ;;  %v806_v34 = vmul.f32 %v800_v26, %v796_v32  ;;  %v737_v50 = vmul.f32 %v733_v38, %v729_v13  ;;  %v653_v25 = vld [vmem:[%s2987_s0] ss:$8 sm:$0x3]  ;;  %v712_v53 = vmul.f32 %v708_v18, %v701_v19 }
 0x1e0   : > { %v681_v28 = vperm.slane %v1878_v21, 0  ;;  %v682_v29 = vperm.slane %v1878_v21, 1  ;;  %v675_v32 = vsel %vm407_vm6, %v2299_v52, %v2305_v56 }
 0x1e1   : > { %934 = vmatpush.msra.mxu2 %v805_v33  ;;  %992 = vmatpush.msrb.mxu3 %v806_v34  ;;  %v677_v33 = vsel %vm407_vm6, %v2305_v56, %v2299_v52 }
 0x1e2   : > { %v685_v56 = vmul.f32 %v681_v28, %v677_v33 }
 0x1e3   : > { %935 = vmatpush.msra.mxu2 %v803_v35  ;;  %993 = vmatpush.msrb.mxu3 %v804_v36  ;;  %v648_v36 = vpop.permute.xlu2 %647 }
 0x1e4   : > { %1887 = vmatmul.msk.f32.gmra.mxu3 %vm919_vm9, %v632_v41 }
 0x1e5   : > { %v722_v42 = vpop.permute.xlu1 %721  ;;  %v762_v43 = vpop.permute.xlu0 %761  ;;  %1891 = vmatmul.msk.f32.gmra.mxu0 %vm919_vm9, %v632_v41  ;;  %v655_v41 = vperm.slane %v653_v25, 0 }
 0x1e6   : > { %v768_v55 = vsel %vm472_vm3, %v762_v43, %v766_v23  ;;  %v770_v57 = vsel %vm472_vm3, %v766_v23, %v762_v43  ;;  %v728_v5 = vsel %vm443_vm4, %v722_v42, %v726_v39  ;;  %v730_v6 = vsel %vm443_vm4, %v726_v39, %v722_v42 }
 0x1e7   : > { %v779_v59 = vmul.f32 %v773_v44, %v768_v55  ;;  %v780_v60 = vmul.f32 %v774_v45, %v770_v57  ;;  %v739_v31 = vmul.f32 %v733_v38, %v730_v6  ;;  %v740_v14 = vmul.f32 %v734_v11, %v728_v5  ;;  %v639_v45 = vld [vmem:[%s2992_s5 + $0x10] sm:$0xff] }
 0x1e8   : > { %v656_v42 = vperm.slane %v653_v25, 1  ;;  %v686_v44 = vmul.f32 %v682_v29, %v675_v32  ;;  %911 = vperm.xlu0 %1949, %v639_v45  }
 0x1e9   : > { %936 = vmatpush.msra.mxu2 %v779_v59  ;;  %994 = vmatpush.msrb.mxu3 %v780_v60 }
 0x1eb   : > { %937 = vmatpush.msra.mxu2 %v777_v61  ;;  %995 = vmatpush.msrb.mxu3 %v778_v62  ;;  %v629_v62 = vld [vmem:[%s2991_s4] sm:$0xff] }
 0x1ec   : > { %1888 = vmatmul.msk.f32.gmra.mxu3 %vm919_vm9, %v634_v2 }
 0x1ed   : > { %v674_v8 = vpop.permute.xlu1 %673  ;;  %v700_v9 = vpop.permute.xlu0 %699  ;;  %938 = vmatpush.msra.mxu2 %v753_v51  ;;  %996 = vmatpush.msrb.mxu3 %v754_v1 }
 0x1ee   : > { %1892 = vmatmul.msk.f32.gmra.mxu0 %vm919_vm9, %v634_v2  ;;  %v702_v15 = vsel %vm425_vm5, %v696_v3, %v700_v9  ;;  %v704_v16 = vsel %vm425_vm5, %v700_v9, %v696_v3  ;;  %v917_v3 = vpop.permute.xlu2 %916 }
 0x1ef   : > { %939 = vmatpush.msra.mxu2 %v751_v10  ;;  %997 = vmatpush.msrb.mxu3 %v752_v37  ;;  %v713_v22 = vmul.f32 %v707_v17, %v704_v16  ;;  %v714_v23 = vmul.f32 %v708_v18, %v702_v15 }
 0x1f1   : > { %940 = vmatpush.msra.mxu2 %v739_v31  ;;  %998 = vmatpush.msrb.mxu3 %v740_v14 }
 0x1f3   : > { %941 = vmatpush.msra.mxu2 %v737_v50  ;;  %999 = vmatpush.msrb.mxu3 %v738_v54 }
 0x1f4   : > { %1889 = vmatmul.msk.f32.gmra.mxu3 %vm919_vm9, %v636_v24 }
 0x1f5   : > { %v644_v26 = vpop.permute.xlu1 %643  ;;  %v670_v27 = vpop.permute.xlu0 %669  ;;  %942 = vmatpush.msra.mxu2 %v713_v22  ;;  %1000 = vmatpush.msrb.mxu3 %v714_v23 }
 0x1f6   : > { %v676_v34 = vsel %vm407_vm6, %v670_v27, %v674_v8  ;;  %v678_v35 = vsel %vm407_vm6, %v674_v8, %v670_v27  ;;  %v650_v43 = vsel %vm390_vm7, %v644_v26, %v648_v36  ;;  %v652_v52 = vsel %vm390_vm7, %v648_v36, %v644_v26  ;;  %1893 = vmatmul.msk.f32.gmra.mxu0 %vm919_vm9, %v636_v24  ;;  %v902_v8 = vpop.permute.xlu2 %901 }
 0x1f7   : > { %943 = vmatpush.msra.mxu2 %v711_v49  ;;  %1001 = vmatpush.msrb.mxu3 %v712_v53  ;;  %v687_v39 = vmul.f32 %v681_v28, %v678_v35  ;;  %v688_v40 = vmul.f32 %v682_v29, %v676_v34  ;;  %v661_v47 = vmul.f32 %v655_v41, %v652_v52 }
 0x1f8   : > { %v662_v48 = vmul.f32 %v656_v42, %v650_v43 }
 0x1f9   : > { %944 = vmatpush.msra.mxu2 %v687_v39  ;;  %1002 = vmatpush.msrb.mxu3 %v688_v40 }
 0x1fb   : > { %945 = vmatpush.msra.mxu2 %v685_v56  ;;  %1003 = vmatpush.msrb.mxu3 %v686_v44 }
 0x1fd   : > { %v646_v55 = vpop.permute.xlu1 %645  ;;  %v642_v57 = vpop.permute.xlu0 %641  ;;  %946 = vmatpush.msra.mxu2 %v661_v47  ;;  %1004 = vmatpush.msrb.mxu3 %v662_v48 }
 0x1fe   : > { %v649_v58 = vsel %vm390_vm7, %v642_v57, %v646_v55  ;;  %v651_v59 = vsel %vm390_vm7, %v646_v55, %v642_v57 }
 0x1ff   : > { %v659_v60 = vmul.f32 %v655_v41, %v651_v59  ;;  %v660_v61 = vmul.f32 %v656_v42, %v649_v58 }
 0x201   : > { %947 = vmatpush.msra.mxu2 %v659_v60  ;;  %1005 = vmatpush.msrb.mxu3 %v660_v61 }
 0x202   : > { %948 = vmatmul.f32.vlgmr.msra.gmra.mxu2 %v629_v62  ;;  %1006 = vmatmul.f32.vlgmr.msrb.gmra.mxu3 %v629_v62 }
 0x205   : > { %v907_v14 = vpop.permute.xlu1 %906 }
 0x20a   : > { %951 = vmatmul.f32.gmra.mxu2 %v631_v63  ;;  %1009 = vmatmul.f32.gmra.mxu3 %v631_v63 }
 0x212   : > { %954 = vmatmul.f32.gmra.mxu2 %v633_v0  ;;  %1012 = vmatmul.f32.gmra.mxu3 %v633_v0 }
 0x21a   : > { %957 = vmatmul.f32.gmra.mxu2 %v635_v46  ;;  %1015 = vmatmul.f32.gmra.mxu3 %v635_v46 }
 0x25a   : > { %v1036_v6 = vpop.f32.mrf.mxu0  ;;  %v912_v22 = vpop.permute.xlu0 %911 }
 0x25f   : > { %v978_v51 = vpop.f32.mrf.mxu3 }
 0x262   : > { %v1039_v13 = vpop.f32.mrf.mxu0 }
 0x267   : > { %v981_v1 = vpop.f32.mrf.mxu3 }
 0x26b   : > { %v1042_v21 = vpop.f32.mrf.mxu0 }
 0x26f   : > { %v984_v2 = vpop.f32.mrf.mxu3 }
 0x273   : > { %v1045_v29 = vpop.f32.mrf.mxu0 }
 0x277   : > { %v987_v5 = vpop.f32.mrf.mxu3 }
 0x285   : > { %v949_v9 = vpop.f32.mrf.mxu2  ;;  %v1007_v10 = vpop.f32.mrf.mxu3 }
 0x286   : > { %v950_v37 = vadd.f32 %v949_v9, %v902_v8  ;;  %v1008_v38 = vadd.f32 %v1007_v10, %v902_v8 }
 0x288   : > { %v979_v11 = vadd.f32 %v978_v51, %v950_v37  ;;  %v1037_v12 = vadd.f32 %v1036_v6, %v1008_v38 }
 0x28a   : > { %v2455_v30 = vmax.f32 %v979_v11, 0.0  ;;  %v2457_v31 = vmax.f32 %v1037_v12, 0.0 }
 0x28c   : > { %3017 = vst [vmem:[#allocation6_spill] sm:$0xff] %v2455_v30  ;;  %1364 = vrot.lane.b32.xlu2 %v2455_v30, %s1974_s28  ;;  %1158 = vrot.lane.b32.xlu0 %v2455_v30, %s1979_s13 }
 0x28d   : > { %3018 = vst [vmem:[#allocation7_spill] sm:$0xff] %v2457_v31  ;;  %1204 = vrot.lane.b32.xlu1 %v2455_v30, %s1978_s12  ;;  %v952_v15 = vpop.f32.mrf.mxu2  ;;  %v1010_v16 = vpop.f32.mrf.mxu3 }
 0x28e   : > { %1056 = vst [vmem:[%s2459_s30] sm:$0xff] %v2455_v30  ;;  %v953_v50 = vadd.f32 %v952_v15, %v907_v14  ;;  %v1011_v54 = vadd.f32 %v1010_v16, %v907_v14 }
 0x28f   : > { %1057 = vst [vmem:[%s2459_s30 + $0x8] sm:$0xff] %v2457_v31 }
 0x290   : > { %v982_v17 = vadd.f32 %v981_v1, %v953_v50  ;;  %v1040_v18 = vadd.f32 %v1039_v13, %v1011_v54 }
 0x292   : > { %v2471_v19 = vmax.f32 %v982_v17, 0.0  ;;  %v2473_v20 = vmax.f32 %v1040_v18, 0.0 }
 0x294   : > { %3019 = vst [vmem:[#allocation8_spill] sm:$0xff] %v2471_v19  ;;  %1066 = vrot.lane.b32.xlu2 %v2455_v30, %s3016_s19  ;;  %1318 = vrot.lane.b32.xlu0 %v2455_v30, %s3021_s15 }
 0x295   : > { %3020 = vst [vmem:[#allocation9_spill] sm:$0xff] %v2473_v20  ;;  %1112 = vrot.lane.b32.xlu1 %v2455_v30, %s3015_s27  ;;  %v955_v23 = vpop.f32.mrf.mxu2  ;;  %v1013_v24 = vpop.f32.mrf.mxu3 }
 0x296   : > { %1058 = vst [vmem:[%s2459_s30 + $0x10] sm:$0xff] %v2471_v19  ;;  %v956_v25 = vadd.f32 %v955_v23, %v912_v22  ;;  %v1014_v26 = vadd.f32 %v1013_v24, %v912_v22  ;;  %v1065_v23 = vld [vmem:[#allocation3] sm:$0x1] }
 0x297   : > { %1059 = vst [vmem:[%s2459_s30 + $0x18] sm:$0xff] %v2473_v20 }
 0x298   : > { %v985_v27 = vadd.f32 %v984_v2, %v956_v25  ;;  %v1043_v49 = vadd.f32 %v1042_v21, %v1014_v26 }
 0x29a   : > { %v2485_v53 = vmax.f32 %v985_v27, 0.0  ;;  %v2487_v28 = vmax.f32 %v1043_v49, 0.0 }
 0x29c   : > { %3022 = vst [vmem:[#allocation10_spill] sm:$0xff] %v2487_v28  ;;  %1212 = vrot.lane.b32.xlu2 %v2457_v31, %s1978_s12  ;;  %1372 = vrot.lane.b32.xlu0 %v2457_v31, %s1974_s28 }
 0x29d   : > { %1060 = vst [vmem:[%s2459_s30 + $0x20] sm:$0xff] %v2485_v53  ;;  %1272 = vrot.lane.b32.xlu1 %v2455_v30, %s3023_s14  ;;  %v958_v32 = vpop.f32.mrf.mxu2  ;;  %v1016_v33 = vpop.f32.mrf.mxu3 }
 0x29e   : > { %1061 = vst [vmem:[%s2459_s30 + $0x28] sm:$0xff] %v2487_v28  ;;  %v959_v34 = vadd.f32 %v958_v32, %v917_v3  ;;  %v1017_v35 = vadd.f32 %v1016_v33, %v917_v3 }
 0x2a0   : > { %v988_v36 = vadd.f32 %v987_v5, %v959_v34  ;;  %v1046_v39 = vadd.f32 %v1045_v29, %v1017_v35 }
 0x2a2   : > { %v2499_v40 = vmax.f32 %v988_v36, 0.0  ;;  %v2501_v41 = vmax.f32 %v1046_v39, 0.0 }
 0x2a4   : > { %1062 = vst [vmem:[%s2459_s30 + $0x30] sm:$0xff] %v2499_v40  ;;  %1120 = vrot.lane.b32.xlu2 %v2457_v31, %s3015_s27  ;;  %1074 = vrot.lane.b32.xlu0 %v2457_v31, %s3016_s19 }
 0x2a5   : > { %1063 = vst [vmem:[%s2459_s30 + $0x38] sm:$0xff] %v2501_v41  ;;  %1166 = vrot.lane.b32.xlu1 %v2457_v31, %s1979_s13 }
 0x2ac   : > { %1206 = vrot.lane.b32.xlu2 %v2471_v19, %s1978_s12  ;;  %1114 = vrot.lane.b32.xlu0 %v2471_v19, %s3015_s27 }
 0x2ad   : > { %1326 = vrot.lane.b32.xlu1 %v2457_v31, %s3021_s15 }
 0x2b4   : > { %1160 = vrot.lane.b32.xlu2 %v2471_v19, %s1979_s13  ;;  %1274 = vrot.lane.b32.xlu0 %v2471_v19, %s3023_s14 }
 0x2b5   : > { %1366 = vrot.lane.b32.xlu1 %v2471_v19, %s1974_s28 }
 0x2bc   : > { %1320 = vrot.lane.b32.xlu2 %v2471_v19, %s3021_s15  ;;  %1214 = vrot.lane.b32.xlu0 %v2473_v20, %s1978_s12 }
 0x2bd   : > { %1068 = vrot.lane.b32.xlu1 %v2471_v19, %s3016_s19 }
 0x2c4   : > { %1374 = vrot.lane.b32.xlu2 %v2473_v20, %s1974_s28  ;;  %1168 = vrot.lane.b32.xlu0 %v2473_v20, %s1979_s13 }
 0x2c5   : > { %1122 = vrot.lane.b32.xlu1 %v2473_v20, %s3015_s27 }
 0x2cc   : > { %1076 = vrot.lane.b32.xlu2 %v2473_v20, %s3016_s19  ;;  %1328 = vrot.lane.b32.xlu0 %v2473_v20, %s3021_s15 }
 0x2cd   : > { %1282 = vrot.lane.b32.xlu1 %v2473_v20, %s3023_s14 }
 0x2d4   : > { %1116 = vrot.lane.b32.xlu2 %v2485_v53, %s3015_s27  ;;  %1208 = vrot.lane.b32.xlu0 %v2485_v53, %s1978_s12 }
 0x2d5   : > { %1162 = vrot.lane.b32.xlu1 %v2485_v53, %s1979_s13 }
 0x2dc   : > { %1276 = vrot.lane.b32.xlu2 %v2485_v53, %s3023_s14  ;;  %1368 = vrot.lane.b32.xlu0 %v2485_v53, %s1974_s28 }
 0x2dd   : > { %1322 = vrot.lane.b32.xlu1 %v2485_v53, %s3021_s15 }
 0x2e4   : > { %1170 = vrot.lane.b32.xlu2 %v2487_v28, %s1979_s13  ;;  %1070 = vrot.lane.b32.xlu0 %v2485_v53, %s3016_s19 }
 0x2e5   : > { %1216 = vrot.lane.b32.xlu1 %v2487_v28, %s1978_s12 }
 0x2e6   : > { %v1365_v42 = vpop.permute.xlu2 %1364 }
 0x2ec   : > { %1330 = vrot.lane.b32.xlu2 %v2487_v28, %s3021_s15  ;;  %1124 = vrot.lane.b32.xlu0 %v2487_v28, %s3015_s27 }
 0x2ed   : > { %1376 = vrot.lane.b32.xlu1 %v2487_v28, %s1974_s28 }
 0x2ee   : > { %v1067_v43 = vpop.permute.xlu2 %1066 }
 0x2f4   : > { %1370 = vrot.lane.b32.xlu2 %v2499_v40, %s1974_s28  ;;  %1284 = vrot.lane.b32.xlu0 %v2487_v28, %s3023_s14 }
 0x2f5   : > { %1078 = vrot.lane.b32.xlu1 %v2487_v28, %s3016_s19 }
 0x2f6   : > { %v1213_v52 = vpop.permute.xlu2 %1212 }
 0x2fc   : > { %1072 = vrot.lane.b32.xlu2 %v2499_v40, %s3016_s19  ;;  %1164 = vrot.lane.b32.xlu0 %v2499_v40, %s1979_s13 }
 0x2fd   : > { %1210 = vrot.lane.b32.xlu1 %v2499_v40, %s1978_s12 }
 0x2fe   : > { %v1121_v56 = vpop.permute.xlu2 %1120  ;;  %v1159_v44 = vpop.permute.xlu0 %1158 }
 0x2ff   : > { %v1205_v45 = vpop.permute.xlu1 %1204 }
 0x300   : > { %v2581_v47 = vsel %vm443_vm4, %v1205_v45, %v1213_v52  ;;  %v2585_v48 = vsel %vm443_vm4, %v1213_v52, %v1205_v45 }
 0x304   : > { %1218 = vrot.lane.b32.xlu2 %v2501_v41, %s1978_s12  ;;  %1324 = vrot.lane.b32.xlu0 %v2499_v40, %s3021_s15  ;;  %s3024_s12 = smov 111  }
 0x305   : > { %1118 = vrot.lane.b32.xlu1 %v2499_v40, %s3015_s27 }
 0x306   : > { %v1207_v55 = vpop.permute.xlu2 %1206  ;;  %v1319_v57 = vpop.permute.xlu0 %1318 }
 0x307   : > { %v1113_v58 = vpop.permute.xlu1 %1112 }
 0x308   : > { %v2595_v59 = vsel %vm407_vm6, %v1113_v58, %v1121_v56  ;;  %v2599_v60 = vsel %vm407_vm6, %v1121_v56, %v1113_v58 }
 0x30c   : > { %1280 = vrot.lane.b32.xlu2 %v2457_v31, %s3023_s14  ;;  %1378 = vrot.lane.b32.xlu0 %v2501_v41, %s1974_s28 }
 0x30d   : > { %1278 = vrot.lane.b32.xlu1 %v2499_v40, %s3023_s14 }
 0x30e   : > { %v1161_v61 = vpop.permute.xlu2 %1160  ;;  %v1373_v62 = vpop.permute.xlu0 %1372 }
 0x30f   : > { %v2609_v63 = vsel %vm508_vm0, %v1365_v42, %v1373_v62  ;;  %v2613_v0 = vsel %vm508_vm0, %v1373_v62, %v1365_v42  ;;  %v2615_v46 = vpop.permute.xlu1 %1272 }
 0x314   : > { %1126 = vrot.lane.b32.xlu2 %v2501_v41, %s3015_s27  ;;  %1416 = vrot.lane.b32.xlu0 %v2499_v40, %s3024_s12 }
 0x315   : > { %1172 = vrot.lane.b32.xlu1 %v2501_v41, %s1979_s13 }
 0x316   : > { %v1321_v51 = vpop.permute.xlu2 %1320  ;;  %v1075_v1 = vpop.permute.xlu0 %1074 }
 0x317   : > { %v2625_v2 = vsel %vm390_vm7, %v1067_v43, %v1075_v1  ;;  %v2629_v3 = vsel %vm390_vm7, %v1075_v1, %v1067_v43  ;;  %v1167_v5 = vpop.permute.xlu1 %1166 }
 0x318   : > { %v2633_v6 = vsel %vm425_vm5, %v1159_v44, %v1167_v5  ;;  %v2637_v8 = vsel %vm425_vm5, %v1167_v5, %v1159_v44 }
 0x31c   : > { %1286 = vrot.lane.b32.xlu2 %v2501_v41, %s3023_s14  ;;  %1080 = vrot.lane.b32.xlu0 %v2501_v41, %s3016_s19 }
 0x31d   : > { %1332 = vrot.lane.b32.xlu1 %v2501_v41, %s3021_s15  ;;  %s1912_s15 = sshll.u32 (%p2066_p4), %s2054_s7, 4 }
 0x31e   : > { %v1115_v9 = vpop.permute.xlu0 %1114  ;;  %v1375_v10 = vpop.permute.xlu2 %1374  ;;  %s1693_s23 = scalar_lea.vmem (%p2066_p4), %s2995_s8, %s1912_s15 }
 0x31f   : > { %v1327_v37 = vpop.permute.xlu1 %1326 }
 0x320   : > { %v2647_v38 = vsel %vm490_vm2, %v1319_v57, %v1327_v37  ;;  %v2651_v11 = vsel %vm490_vm2, %v1327_v37, %v1319_v57  ;;  %v1896_v37 = vld [vmem:[%s2987_s0 + $0x3] ss:$8 sm:$0x3] }
 0x324   : > { %1414 = vrot.lane.b32.xlu2 %v2485_v53, %s3024_s12  ;;  %1422 = vrot.lane.b32.xlu0 %v2487_v28, %s3024_s12 }
 0x325   : > { %1412 = vrot.lane.b32.xlu1 %v2471_v19, %s3024_s12 }
 0x326   : > { %v1275_v12 = vpop.permute.xlu0 %1274  ;;  %v1077_v16 = vpop.permute.xlu2 %1076 }
 0x327   : > { %v1367_v13 = vpop.permute.xlu1 %1366 }
 0x328   : > { %v2661_v14 = vsel %vm508_vm0, %v1367_v13, %v1375_v10  ;;  %v2665_v15 = vsel %vm508_vm0, %v1375_v10, %v1367_v13  ;;  %v1231_v13 = vperm.slane %v1896_v37, 1 }
 0x32c   : > { %1420 = vrot.lane.b32.xlu2 %v2473_v20, %s3024_s12  ;;  %1410 = vrot.lane.b32.xlu0 %v2455_v30, %s3024_s12 }
 0x32d   : > { %1424 = vrot.lane.b32.xlu1 %v2501_v41, %s3024_s12 }
 0x32e   : > { %v1215_v50 = vpop.permute.xlu0 %1214  ;;  %v2685_v24 = vpop.permute.xlu2 %1116 }
 0x32f   : > { %v1221_v54 = vsel %vm443_vm4, %v1207_v55, %v1215_v50  ;;  %v1225_v17 = vsel %vm443_vm4, %v1215_v50, %v1207_v55  ;;  %v1069_v18 = vpop.permute.xlu1 %1068 }
 0x330   : > { %v2679_v21 = vsel %vm390_vm7, %v1069_v18, %v1077_v16  ;;  %v2683_v22 = vsel %vm390_vm7, %v1077_v16, %v1069_v18  ;;  %v1230_v18 = vperm.slane %v1896_v37, 0  ;;  %v1237_v20 = vmul.f32 %v1231_v13, %v1221_v54 }
 0x332   : > { %v1236_v37 = vmul.f32 %v1230_v18, %v1225_v17  ;;  %v1234_v28 = vmul.f32 %v1230_v18, %v2585_v48 }
 0x334   : > { %1530 = vperm.xlu2 %1948, %v1065_v23  }
 0x335   : > { %1418 = vrot.lane.b32.xlu1 %v2457_v31, %s3024_s12 }
 0x336   : > { %v1169_v25 = vpop.permute.xlu0 %1168  ;;  %v2705_v33 = vpop.permute.xlu2 %1276 }
 0x337   : > { %v2691_v26 = vsel %vm425_vm5, %v1161_v61, %v1169_v25  ;;  %v2695_v27 = vsel %vm425_vm5, %v1169_v25, %v1161_v61  ;;  %v1123_v49 = vpop.permute.xlu1 %1122 }
 0x338   : > { %v2699_v29 = vsel %vm407_vm6, %v1115_v9, %v1123_v49  ;;  %v2703_v32 = vsel %vm407_vm6, %v1123_v49, %v1115_v9 }
 0x33e   : > { %v1329_v34 = vpop.permute.xlu0 %1328  ;;  %v2723_v56 = vpop.permute.xlu2 %1170 }
 0x33f   : > { %v2709_v35 = vsel %vm490_vm2, %v1321_v51, %v1329_v34  ;;  %v2713_v36 = vsel %vm490_vm2, %v1329_v34, %v1321_v51  ;;  %v1283_v39 = vpop.permute.xlu1 %1282 }
 0x340   : > { %v2717_v42 = vsel %vm472_vm3, %v1275_v12, %v1283_v39  ;;  %v2721_v43 = vsel %vm472_vm3, %v1283_v39, %v1275_v12 }
 0x346   : > { %v1209_v52 = vpop.permute.xlu0 %1208  ;;  %v2729_v57 = vpop.permute.xlu2 %1330 }
 0x347   : > { %v2725_v44 = vpop.permute.xlu1 %1162 }
 0x34e   : > { %v1369_v45 = vpop.permute.xlu0 %1368  ;;  %v1371_v62 = vpop.permute.xlu2 %1370 }
 0x34f   : > { %v2727_v55 = vpop.permute.xlu1 %1322 }
 0x356   : > { %v2731_v58 = vpop.permute.xlu0 %1070  ;;  %v2735_v5 = vpop.permute.xlu2 %1072 }
 0x357   : > { %v1217_v61 = vpop.permute.xlu1 %1216 }
 0x358   : > { %v1222_v23 = vsel %vm443_vm4, %v1209_v52, %v1217_v61  ;;  %v1226_v25 = vsel %vm443_vm4, %v1217_v61, %v1209_v52  ;;  %v1235_v52 = vmul.f32 %v1231_v13, %v2581_v47 }
 0x359   : > { %v1239_v31 = vmul.f32 %v1231_v13, %v1222_v23  ;;  %v1238_v30 = vmul.f32 %v1230_v18, %v1226_v25  ;;  %v1895_v25 = vld [vmem:[%s2987_s0 + $0x2] ss:$8 sm:$0x3] }
 0x35e   : > { %v2733_v51 = vpop.permute.xlu0 %1124  ;;  %v1219_v16 = vpop.permute.xlu2 %1218 }
 0x35f   : > { %v1377_v1 = vpop.permute.xlu1 %1376 }
 0x360   : > { %v1382_v17 = vsel %vm508_vm0, %v1369_v45, %v1377_v1 }
 0x366   : > { %v2737_v9 = vpop.permute.xlu0 %1284 }
 0x367   : > { %v2739_v10 = vpop.permute.xlu1 %1078 }
 0x36e   : > { %v1165_v12 = vpop.permute.xlu0 %1164 }
 0x36f   : > { %v1211_v50 = vpop.permute.xlu1 %1210 }
 0x370   : > { %v1223_v49 = vsel %vm443_vm4, %v1211_v50, %v1219_v16  ;;  %v1227_v34 = vsel %vm443_vm4, %v1219_v16, %v1211_v50  ;;  %v2756_v16 = vpop.permute.xlu2 %1280 }
 0x371   : > { %v1241_v39 = vmul.f32 %v1231_v13, %v1223_v49  ;;  %v1240_v4 = vmul.f32 %v1230_v18, %v1227_v34 }
 0x373   : > { %1543 = vmatpush.msrb.mxu1 %v1240_v4  ;;  %1603 = vmatpush.msra.mxu0 %v1241_v39  ;;  %v1900_v4 = vld [vmem:[%s2987_s0 + $0x7] ss:$8 sm:$0x3]  ;;  %v1185_v39 = vperm.slane %v1895_v25, 1 }
 0x374   : > { %v1390_v54 = vperm.slane %v1900_v4, 0 }
 0x375   : > { %1544 = vmatpush.msrb.mxu1 %v1238_v30  ;;  %1604 = vmatpush.msra.mxu0 %v1239_v31  ;;  %v1391_v30 = vperm.slane %v1900_v4, 1  ;;  %v1184_v4 = vperm.slane %v1895_v25, 0 }
 0x376   : > { %v2752_v19 = vpop.permute.xlu0 %1324  ;;  %v1398_v23 = vmul.f32 %v1390_v54, %v1382_v17  ;;  %v1396_v49 = vmul.f32 %v1390_v54, %v2661_v14  ;;  %v1394_v34 = vmul.f32 %v1390_v54, %v2609_v63 }
 0x377   : > { %1545 = vmatpush.msrb.mxu1 %v1236_v37  ;;  %1605 = vmatpush.msra.mxu0 %v1237_v20  ;;  %v1119_v61 = vpop.permute.xlu1 %1118  ;;  %v1386_v20 = vsel %vm508_vm0, %v1377_v1, %v1369_v45  ;;  %v1397_v45 = vmul.f32 %v1391_v30, %v2665_v15  ;;  %v1176_v37 = vsel %vm425_vm5, %v2725_v44, %v2723_v56 }
 0x378   : > { %v1399_v18 = vmul.f32 %v1391_v30, %v1386_v20  ;;  %v1127_v1 = vpop.permute.xlu2 %1126  ;;  %v1180_v15 = vsel %vm425_vm5, %v2723_v56, %v2725_v44  ;;  %v1899_v56 = vld [vmem:[%s2987_s0 + $0x6] ss:$8 sm:$0x3]  ;;  %v1193_v44 = vmul.f32 %v1185_v39, %v1176_v37  ;;  %v1188_v25 = vmul.f32 %v1184_v4, %v2637_v8  ;;  %v1090_v37 = vld [vmem:[%s2987_s0] ss:$8 sm:$0x3] }
 0x379   : > { %1546 = vmatpush.msrb.mxu1 %v1234_v28  ;;  %1606 = vmatpush.msra.mxu0 %v1235_v52  ;;  %v1192_v17 = vmul.f32 %v1184_v4, %v1180_v15  ;;  %v1130_v8 = vsel %vm407_vm6, %v2685_v24, %v2733_v51 }
 0x37e   : > { %v1379_v31 = vpop.permute.xlu0 %1378 }
 0x37f   : > { %v1383_v47 = vsel %vm508_vm0, %v1371_v62, %v1379_v31  ;;  %v1387_v28 = vsel %vm508_vm0, %v1379_v31, %v1371_v62  ;;  %v2769_v48 = vpop.permute.xlu1 %1278  ;;  %v1395_v62 = vmul.f32 %v1391_v30, %v2613_v0 }
 0x380   : > { %v1401_v13 = vmul.f32 %v1391_v30, %v1387_v28  ;;  %v1400_v50 = vmul.f32 %v1390_v54, %v1383_v47  ;;  %v1894_v54 = vld [vmem:[%s2987_s0 + $0x1] ss:$8 sm:$0x3]  ;;  %v1190_v47 = vmul.f32 %v1184_v4, %v2695_v27 }
 0x381   : > { %v1139_v20 = vperm.slane %v1894_v54, 1  ;;  %v1138_v28 = vperm.slane %v1894_v54, 0 }
 0x382   : > { %1563 = vmatpush.msrb.mxu2 %v1400_v50  ;;  %1623 = vmatpush.msra.mxu3 %v1401_v13  ;;  %v1189_v13 = vmul.f32 %v1185_v39, %v2633_v6  ;;  %v1345_v50 = vperm.slane %v1899_v56, 1  ;;  %v1131_v6 = vsel %vm407_vm6, %v1119_v61, %v1127_v1 }
 0x383   : > { %v1142_v15 = vmul.f32 %v1138_v28, %v2599_v60  ;;  %v1144_v54 = vmul.f32 %v1138_v28, %v2703_v32 }
 0x384   : > { %1564 = vmatpush.msrb.mxu2 %v1398_v23  ;;  %1624 = vmatpush.msra.mxu3 %v1399_v18  ;;  %v1287_v18 = vpop.permute.xlu2 %1286  ;;  %v1135_v23 = vsel %vm407_vm6, %v1127_v1, %v1119_v61 }
 0x385   : > { %v1148_v1 = vmul.f32 %v1138_v28, %v1135_v23 }
 0x386   : > { %1565 = vmatpush.msrb.mxu2 %v1396_v49  ;;  %1625 = vmatpush.msra.mxu3 %v1397_v45  ;;  %v2790_v63 = vpop.permute.xlu0 %1416  ;;  %v1336_v45 = vsel %vm490_vm2, %v2727_v55, %v2729_v57  ;;  %v1344_v49 = vperm.slane %v1899_v56, 0  ;;  %v1291_v56 = vsel %vm472_vm3, %v2769_v48, %v1287_v18 }
 0x387   : > { %v1173_v52 = vpop.permute.xlu1 %1172 }
 0x388   : > { %v1177_v0 = vsel %vm425_vm5, %v1165_v12, %v1173_v52  ;;  %v1181_v14 = vsel %vm425_vm5, %v1173_v52, %v1165_v12  ;;  %1566 = vmatpush.msrb.mxu2 %v1394_v34  ;;  %1626 = vmatpush.msra.mxu3 %v1395_v62  ;;  %v1191_v12 = vmul.f32 %v1185_v39, %v2691_v26 }
 0x389   : > { %v1195_v30 = vmul.f32 %v1185_v39, %v1177_v0  ;;  %v1194_v31 = vmul.f32 %v1184_v4, %v1181_v14  ;;  %v1340_v26 = vsel %vm490_vm2, %v2729_v57, %v2727_v55  ;;  %v1134_v62 = vsel %vm407_vm6, %v2733_v51, %v2685_v24  ;;  %v1898_v0 = vld [vmem:[%s2987_s0 + $0x5] ss:$8 sm:$0x3] }
 0x38a   : > { %v1143_v39 = vmul.f32 %v1139_v20, %v2595_v59  ;;  %v1149_v24 = vmul.f32 %v1139_v20, %v1131_v6  ;;  %v1146_v52 = vmul.f32 %v1138_v28, %v1134_v62  ;;  %v1352_v4 = vmul.f32 %v1344_v49, %v1336_v45  ;;  %v1897_v62 = vld [vmem:[%s2987_s0 + $0x4] ss:$8 sm:$0x3] }
 0x38b   : > { %1547 = vmatpush.msrb.mxu1 %v1194_v31  ;;  %1607 = vmatpush.msra.mxu0 %v1195_v30  ;;  %v1353_v14 = vmul.f32 %v1345_v50, %v1340_v26  ;;  %v1147_v59 = vmul.f32 %v1139_v20, %v1130_v8  ;;  %v2837_v30 = vperm.slane %v1090_v37, 1  ;;  %v1145_v31 = vmul.f32 %v1139_v20, %v2699_v29  ;;  %v2890_v26 = vld [vmem:[%s2993_s6] sm:$0x7] }
 0x38c   : > { %v1350_v60 = vmul.f32 %v1344_v49, %v2709_v35  ;;  %v1295_v29 = vsel %vm472_vm3, %v1287_v18, %v2769_v48  ;;  %v1298_v20 = vperm.slane %v1898_v0, 0  ;;  %v1294_v48 = vsel %vm472_vm3, %v2737_v9, %v2705_v33  ;;  %v2870_v28 = vpop.permute.xlu2 %1414 }
 0x38d   : > { %1548 = vmatpush.msrb.mxu1 %v1192_v17  ;;  %1608 = vmatpush.msra.mxu0 %v1193_v44  ;;  %v1092_v17 = vperm.slane %v1090_v37, 0  ;;  %v1292_v6 = vsel %vm472_vm3, %v2756_v16, %v2615_v46  ;;  %v1253_v37 = vperm.slane %v1897_v62, 1 }
 0x38e   : > { %v1081_v51 = vpop.permute.xlu0 %1080  ;;  %v1304_v8 = vmul.f32 %v1298_v20, %v2717_v42  ;;  %v1535_v42 = vperm.slane %v2890_v26, 0 }
 0x38f   : > { %1549 = vmatpush.msrb.mxu1 %v1190_v47  ;;  %1609 = vmatpush.msra.mxu0 %v1191_v12  ;;  %v1333_v27 = vpop.permute.xlu1 %1332  ;;  %v1089_v44 = vsel %vm390_vm7, %v1081_v51, %v2735_v5  ;;  %v1085_v32 = vsel %vm390_vm7, %v2735_v5, %v1081_v51  ;;  %v1299_v12 = vperm.slane %v1898_v0, 1  ;;  %v1290_v47 = vsel %vm472_vm3, %v2705_v33, %v2737_v9 }
 0x390   : > { %v1337_v55 = vsel %vm490_vm2, %v2752_v19, %v1333_v27  ;;  %v1341_v57 = vsel %vm490_vm2, %v1333_v27, %v2752_v19  ;;  %v1349_v19 = vmul.f32 %v1345_v50, %v2651_v11  ;;  %v1351_v11 = vmul.f32 %v1345_v50, %v2713_v36 }
 0x391   : > { %v1355_v61 = vmul.f32 %v1345_v50, %v1341_v57  ;;  %1550 = vmatpush.msrb.mxu1 %v1188_v25  ;;  %1610 = vmatpush.msra.mxu0 %v1189_v13  ;;  %v1354_v34 = vmul.f32 %v1344_v49, %v1337_v55  ;;  %v1348_v36 = vmul.f32 %v1344_v49, %v2647_v38 }
 0x392   : > { %v1088_v5 = vsel %vm390_vm7, %v2739_v10, %v2731_v58  ;;  %v1084_v38 = vsel %vm390_vm7, %v2731_v58, %v2739_v10  ;;  %v1102_v13 = vmul.f32 %v1092_v17, %v1089_v44  ;;  %v1308_v50 = vmul.f32 %v1298_v20, %v1291_v56  ;;  %v2885_v10 = vld [vmem:[%s2987_s0 + $0x10] ss:$8 sm:$0x3] }
 0x393   : > { %1551 = vmatpush.msrb.mxu1 %v1148_v1  ;;  %1567 = vmatpush.msrb.mxu2 %v1354_v34  ;;  %v1309_v18 = vmul.f32 %v1299_v12, %v1295_v29  ;;  %v1103_v33 = vmul.f32 %v2837_v30, %v1085_v32  ;;  %v1100_v9 = vmul.f32 %v1092_v17, %v1088_v5  ;;  %v3029_v32 = vld [vmem:[#allocation7_spill] sm:$0xff] }
 0x394   : > { %1611 = vmatpush.msra.mxu0 %v1149_v24  ;;  %1627 = vmatpush.msra.mxu3 %v1355_v61  ;;  %v1306_v23 = vmul.f32 %v1298_v20, %v1290_v47  ;;  %v1288_v25 = vsel %vm472_vm3, %v2615_v46, %v2756_v16  ;;  %v1307_v45 = vmul.f32 %v1299_v12, %v1294_v48  ;;  %v1436_v46 = vperm.slane %v2885_v10, 0  ;;  %v1421_v24 = vpop.permute.xlu2 %1420 }
 0x395   : > { %1552 = vmatpush.msrb.mxu1 %v1146_v52  ;;  %1568 = vmatpush.msrb.mxu2 %v1352_v4  ;;  %v1101_v58 = vmul.f32 %v2837_v30, %v1084_v38  ;;  %v1098_v49 = vmul.f32 %v1092_v17, %v2683_v22  ;;  %v1099_v55 = vmul.f32 %v2837_v30, %v2679_v21 }
 0x396   : > { %1612 = vmatpush.msra.mxu0 %v1147_v59  ;;  %1628 = vmatpush.msra.mxu3 %v1353_v14  ;;  %v2896_v27 = vpop.permute.xlu0 %1422  ;;  %v1305_v57 = vmul.f32 %v1299_v12, %v2721_v43  ;;  %v1096_v22 = vmul.f32 %v1092_v17, %v2629_v3  ;;  %v1302_v61 = vmul.f32 %v1298_v20, %v1288_v25  ;;  %v1252_v43 = vperm.slane %v1897_v62, 0 }
 0x397   : > { %1553 = vmatpush.msrb.mxu1 %v1144_v54  ;;  %1569 = vmatpush.msrb.mxu2 %v1350_v60  ;;  %v2855_v35 = vpop.permute.xlu1 %1412  ;;  %v1097_v1 = vmul.f32 %v2837_v30, %v2625_v2  ;;  %v1303_v34 = vmul.f32 %v1299_v12, %v1292_v6  ;;  %v1263_v52 = vmul.f32 %v1253_v37, %v2501_v41  ;;  %v1536_v41 = vperm.slane %v2890_v26, 1 }
 0x398   : > { %1613 = vmatpush.msra.mxu0 %v1145_v31  ;;  %1629 = vmatpush.msra.mxu3 %v1351_v11  ;;  %v1262_v2 = vmul.f32 %v1252_v43, %v2499_v40  ;;  %v1427_v51 = vsel %vm526_vm1, %v2855_v35, %v1421_v24  ;;  %v3026_v40 = vld [vmem:[#allocation8_spill] sm:$0xff]  ;;  %v3027_v31 = vld [vmem:[#allocation9_spill] sm:$0xff]  ;;  %v3028_v11 = vld [vmem:[#allocation6_spill] sm:$0xff]  ;;  %v1537_v17 = vperm.slane %v2890_v26, 2  ;;  %v1437_v20 = vperm.slane %v2885_v10, 1 }
 0x399   : > { %1554 = vmatpush.msrb.mxu1 %v1142_v15  ;;  %1570 = vmatpush.msrb.mxu2 %v1348_v36  ;;  %v1260_v15 = vmul.f32 %v1252_v43, %v2485_v53  ;;  %v1442_v14 = vmul.f32 %v1436_v46, %v1427_v51  ;;  %v1258_v59 = vmul.f32 %v1252_v43, %v3026_v40  ;;  %v3030_v62 = vlaneseq }
 0x39a   : > { %1614 = vmatpush.msra.mxu0 %v1143_v39  ;;  %1630 = vmatpush.msra.mxu3 %v1349_v19  ;;  %v1428_v39 = vsel %vm526_vm1, %v2870_v28, %v2896_v27  ;;  %v3025_v19 = vld [vmem:[#allocation10_spill] sm:$0xff]  ;;  %v1259_v54 = vmul.f32 %v1253_v37, %v3027_v31  ;;  %v1256_v56 = vmul.f32 %v1252_v43, %v3028_v11 }
 0x39b   : > { %1555 = vmatpush.msrb.mxu1 %v1102_v13  ;;  %1571 = vmatpush.msrb.mxu2 %v1308_v50  ;;  %v1444_v4 = vmul.f32 %v1436_v46, %v1428_v39  ;;  %v1261_v0 = vmul.f32 %v1253_v37, %v3025_v19  ;;  %v1257_v36 = vmul.f32 %v1253_v37, %v3029_v32  ;;  %vm1673_vm12 = vcmp.lt.s32.totalorder %v3030_v62, 256 }
 0x39c   : > { %1615 = vmatpush.msra.mxu0 %v1103_v33  ;;  %1631 = vmatpush.msra.mxu3 %v1309_v18  ;;  %v1432_v12 = vsel %vm526_vm1, %v2896_v27, %v2870_v28  ;;  %v1531_v50 = vpop.permute.xlu2 %1530 }
 0x39d   : > { %1556 = vmatpush.msrb.mxu1 %v1100_v9  ;;  %1572 = vmatpush.msrb.mxu2 %v1306_v23  ;;  %v1445_v48 = vmul.f32 %v1437_v20, %v1432_v12  ;;  %v1533_v33 = vperm.slane %v1531_v50, 0 }
 0x39e   : > { %1616 = vmatpush.msra.mxu0 %v1101_v58  ;;  %1632 = vmatpush.msra.mxu3 %v1307_v45  ;;  %v1411_v30 = vpop.permute.xlu0 %1410 }
 0x39f   : > { %1557 = vmatpush.msrb.mxu1 %v1098_v49  ;;  %1573 = vmatpush.msrb.mxu2 %v1304_v8  ;;  %v1425_v16 = vpop.permute.xlu1 %1424 }
 0x3a0   : > { %1617 = vmatpush.msra.mxu0 %v1099_v55  ;;  %1633 = vmatpush.msra.mxu3 %v1305_v57  ;;  %v1429_v21 = vsel %vm526_vm1, %v2790_v63, %v1425_v16  ;;  %v1433_v44 = vsel %vm526_vm1, %v1425_v16, %v2790_v63  ;;  %v1431_v63 = vsel %vm526_vm1, %v1421_v24, %v2855_v35  ;;  %v1706_v57 = vld [vmem:[%s2204_s26] sm:$0xff] (%p2066_p4)  ;;  %v1710_v16 = vld [vmem:[%s2204_s26 + $0x10] sm:$0xff] (%p2066_p4) }
 0x3a1   : > { %v1446_v3 = vmul.f32 %v1436_v46, %v1429_v21  ;;  %1558 = vmatpush.msrb.mxu1 %v1096_v22  ;;  %1574 = vmatpush.msrb.mxu2 %v1302_v61  ;;  %v1447_v47 = vmul.f32 %v1437_v20, %v1433_v44  ;;  %v1443_v38 = vmul.f32 %v1437_v20, %v1431_v63  ;;  %v1712_v22 = vld [vmem:[%s2204_s26 + $0x18] sm:$0xff] (%p2066_p4) }
 0x3a2   : > { %1618 = vmatpush.msra.mxu0 %v1097_v1  ;;  %1634 = vmatpush.msra.mxu3 %v1303_v34  ;;  %1707 = vst [vmem:[%s1693_s23] sm:$0xff] (%p2066_p4), %v1706_v57 }
 0x3a3   : > { %1559 = vmatmul.f32.vlgmr.msrb.gmra.mxu1 %v1535_v42  ;;  %1619 = vmatmul.f32.vlgmr.msra.gmra.mxu0 %v1535_v42  ;;  %1711 = vst [vmem:[%s1693_s23 + $0x20] sm:$0xff] (%p2066_p4), %v1710_v16 }
 0x3a4   : > { %1575 = vmatpush.msrb.mxu2 %v1262_v2  ;;  %1595 = vmatpush.msra.mxu1 %v1446_v3  ;;  %1713 = vst [vmem:[%s1693_s23 + $0x28] sm:$0xff] (%p2066_p4), %v1712_v22 }
 0x3a5   : > { %1635 = vmatpush.msra.mxu3 %v1263_v52 }
 0x3a6   : > { %1576 = vmatpush.msrb.mxu2 %v1260_v15  ;;  %1596 = vmatpush.msra.mxu1 %v1444_v4 }
 0x3a7   : > { %1636 = vmatpush.msra.mxu3 %v1261_v0  ;;  %v1419_v60 = vpop.permute.xlu1 %1418 }
 0x3a8   : > { %1577 = vmatpush.msrb.mxu2 %v1258_v59  ;;  %1597 = vmatpush.msra.mxu1 %v1442_v14  ;;  %v1426_v53 = vsel %vm526_vm1, %v1411_v30, %v1419_v60  ;;  %v1430_v5 = vsel %vm526_vm1, %v1419_v60, %v1411_v30 }
 0x3a9   : > { %1637 = vmatpush.msra.mxu3 %v1259_v54  ;;  %v1440_v29 = vmul.f32 %v1436_v46, %v1426_v53  ;;  %v1441_v13 = vmul.f32 %v1437_v20, %v1430_v5  ;;  %v1708_v46 = vld [vmem:[%s2204_s26 + $0x8] sm:$0xff] (%p2066_p4) }
 0x3aa   : > { %1578 = vmatpush.msrb.mxu2 %v1256_v56  ;;  %1709 = vst [vmem:[%s1693_s23 + $0x8] sm:$0xff] (%p2066_p4), %v1708_v46 }
 0x3ab   : > { %1638 = vmatpush.msra.mxu3 %v1257_v36  ;;  %1579 = vmatmul.f32.vlgmr.msrb.gmra.mxu2 %v1536_v41 }
 0x3ac   : > { %1639 = vmatmul.f32.vlgmr.msra.gmra.mxu3 %v1536_v41  ;;  %1598 = vmatpush.msra.mxu1 %v1440_v29 }
 0x3ad   : > { %1902 = vmatmul.msk.f32.vlgmr.msra.gmra.mxu1 %vm1540_vm10, %v1537_v17 }
 0x3ae   : > { %1655 = vmatpush.msrb.mxu1 %v1447_v47 }
 0x3b0   : > { %1656 = vmatpush.msrb.mxu1 %v1445_v48 }
 0x3b2   : > { %1657 = vmatpush.msrb.mxu1 %v1443_v38 }
 0x3b4   : > { %1658 = vmatpush.msrb.mxu1 %v1441_v13 }
 0x3b5   : > { %1903 = vmatmul.msk.f32.vlgmr.msrb.gmra.mxu1 %vm1540_vm10, %v1537_v17 }
 0x420   : > { %v1560_v28 = vpop.f32.mrf.mxu1  ;;  %v1620_v35 = vpop.f32.mrf.mxu0 }
 0x421   : > { %v1561_v9 = vadd.f32 %v1560_v28, %v1533_v33  ;;  %v1621_v25 = vadd.f32 %v1620_v35, %v1533_v33 }
 0x42a   : > { %v1600_v18 = vpop.f32.mrf.mxu1 }
 0x42e   : > { %v1580_v23 = vpop.f32.mrf.mxu2 }
 0x42f   : > { %v1581_v45 = vadd.f32 %v1580_v23, %v1561_v9  ;;  %v1640_v58 = vpop.f32.mrf.mxu3 }
 0x430   : > { %v1641_v7 = vadd.f32 %v1640_v58, %v1621_v25 }
 0x431   : > { %v1601_v26 = vadd.f32 %v1600_v18, %v1581_v45 }
 0x432   : > { %v1660_v10 = vpop.f32.mrf.mxu1 }
 0x433   : > { %v1661_v6 = vadd.f32 %v1660_v10, %v1641_v7  ;;  %v1663_v49 = vmax.f32 %v1601_v26, 0.0 }
 0x435   : > { %v1664_v27 = vmax.f32 %v1661_v6, 0.0 }
 0x436   : > { %1690 = sbr.rel (!%p2066_p4) target bundleno = 1083 (0x43b), region = 56 }
 0x437   : > { %v1667_v8 = vrot.slane %v1664_v27, 7 }
 0x439   : > { %v1669_v55 = vsel %vm1668_vm11, %v1663_v49, %v1667_v8 }
 0x43a   : > { %1675 = vst.msk [vmem:[%s376_s17] sm:$0x3] %vm1673_vm12, %v1669_v55 }
 0x43b PF: > { %1719 = sbr.rel (!%p2066_p4) target bundleno = 1093 (0x445), region = 79  ;;  %s1913_s28 = sshll.u32 (%p2066_p4), %s2054_s7, 4  ;;  %v1735_v61 = vld [vmem:[%s2459_s30] sm:$0xff] (%p2066_p4)  ;;  %v1737_v42 = vld [vmem:[%s2459_s30 + $0x8] sm:$0xff] (%p2066_p4)  ;;  %v1739_v1 = vld [vmem:[%s2459_s30 + $0x10] sm:$0xff] (%p2066_p4) }
 0x43c   : > { %s1722_s27 = scalar_lea.vmem (%p2066_p4), %s2996_s9, %s1913_s28  ;;  %v1741_v34 = vld [vmem:[%s2459_s30 + $0x18] sm:$0xff] (%p2066_p4)  ;;  %v1743_v21 = vld [vmem:[%s2459_s30 + $0x20] sm:$0xff] (%p2066_p4)  ;;  %v1745_v43 = vld [vmem:[%s2459_s30 + $0x28] sm:$0xff] (%p2066_p4) }
 0x43d   : > { %1736 = vst [vmem:[%s1722_s27] sm:$0xff] (%p2066_p4), %v1735_v61  ;;  %v1747_v39 = vld [vmem:[%s2459_s30 + $0x30] sm:$0xff] (%p2066_p4)  ;;  %v1749_v3 = vld [vmem:[%s2459_s30 + $0x38] sm:$0xff] (%p2066_p4) }
 0x43e   : > { %1738 = vst [vmem:[%s1722_s27 + $0x8] sm:$0xff] (%p2066_p4), %v1737_v42 }
 0x43f   : > { %1740 = vst [vmem:[%s1722_s27 + $0x20] sm:$0xff] (%p2066_p4), %v1739_v1 }
 0x440   : > { %1742 = vst [vmem:[%s1722_s27 + $0x28] sm:$0xff] %v1741_v34 }
 0x441   : > { %1744 = vst [vmem:[%s1722_s27 + $0x40] sm:$0xff] %v1743_v21 }
 0x442   : > { %1746 = vst [vmem:[%s1722_s27 + $0x48] sm:$0xff] %v1745_v43 }
 0x443   : > { %1748 = vst [vmem:[%s1722_s27 + $0x60] sm:$0xff] %v1747_v39 }
 0x444   : > { %1750 = vst [vmem:[%s1722_s27 + $0x68] sm:$0xff] %v1749_v3 }
 0x445 PF: > { %p20_p8 = scmp.ge.s32.totalorder %s2056_s18, 4   ;;  %s3031_s15 = smov %s1968_s16 }
 0x446   : > { %s3032_s16 = smov %s2064_s21  ;;  %s3033_s17 = smov %s2056_s18 }
 0x447   :  { %22 = sbr.rel (!%p20_p8) target bundleno = 5 (0x5), region = 160 }

</bundles_post_ra>
